<compile_context>
chip_gen: v5e
topology: v5e:2x2
jax: 0.10.0
libtpu: 0.0.40
codegen_flags: <defaults>
</compile_context>

<pallas_src>
import functools

import jax
import jax.numpy as jnp
from jax import lax
from jax.experimental import pallas as pl
from jax.experimental.pallas import tpu as pltpu


def _round_up(x: int, m: int) -> int:
    return (x + m - 1) // m * m


_SUBLANE = 16          # bf16 packs 2 rows/sublane -> batch-tile rows multiple of 16
_TM_CAP = 1024         # ~10 MiB VMEM working set; safe under every generation's limit
_SPLIT_THRESHOLD = 256 # below this, a single grid step is cheapest


def _pick_batch_tiling(B: int):
    """Returns (tm, b_pad): tile rows per grid step and padded batch size."""
    b_min = _round_up(max(B, 1), _SUBLANE)
    if b_min <= _SPLIT_THRESHOLD:
        # Tiny batch: one grid step; nothing to shard anyway.
        return b_min, b_min
    # Large batch: biggest tile that keeps >= 2 grid steps (v7x 2nd TC / megacore)
    # and stays under the VMEM cap.
    tm = min(_TM_CAP, _round_up(-(-b_min // 2), _SUBLANE))
    b_pad = _round_up(b_min, tm)
    return tm, b_pad


def _net_kernel(x_ref, w1_ref, w2_ref, o_ref, *, num_classes: int):
    # x_ref : [tm, d_pad]   bf16  flattened, zero-padded input tile
    # w1_ref: [d_pad, H]    bf16  fc1 weight (transposed vs torch, zero-padded rows)
    # w2_ref: [H, c_pad]    bf16  fc2 weight (transposed vs torch, zero-padded cols)
    # o_ref : [tm, c_pad]   f32   log-softmax output tile (padded lanes ~ -1e30)

    # fc1 on the MXU: bf16 operands, f32 accumulation; ReLU in f32 on the VPU.
    h = jnp.dot(x_ref[...], w1_ref[...], preferred_element_type=jnp.float32)
    h = jnp.maximum(h, 0.0)

    # Dropout(p=0.5): eval-mode identity.
    # TODO(synk): training-mode dropout (pltpu.prng_seed + stateful_bernoulli)
    # intentionally not applied; the reference forward is eval-mode.

    # fc2 on the MXU. Padded class columns of w2 are zero -> logits there are 0,
    # masked below before the softmax reduction.
    logits = jnp.dot(h.astype(jnp.bfloat16), w2_ref[...],
                     preferred_element_type=jnp.float32)

    # Mask padded class lanes (exp(0) terms would otherwise pollute the sum).
    lane = lax.broadcasted_iota(jnp.int32, logits.shape, 1)
    logits = jnp.where(lane < num_classes, logits, -1e30)

    # Numerically stable log-softmax over the lane-dense class dimension.
    m = jnp.max(logits, axis=1, keepdims=True)
    shifted = logits - m
    lse = jnp.log(jnp.sum(jnp.exp(shifted), axis=1, keepdims=True))
    o_ref[...] = shifted - lse


def prepare_weights(w1_torch, w2_torch):
    """One-time weight prep (transpose + zero-pad + bf16 cast).

    Call once and reuse the result across forward calls; this is static data
    and must not be re-padded/re-cast per inference call.

    w1_torch : [512, 784] float32  (torch fc1.weight layout)
    w2_torch : [10, 512]  float32  (torch fc2.weight layout)
    returns  : (w1_p [d_pad, 512] bf16, w2_p [512, c_pad] bf16, d_in, num_classes)
    """
    hidden, d_in = w1_torch.shape
    num_classes = w2_torch.shape[0]
    assert hidden % 128 == 0
    d_pad = _round_up(d_in, 128)                       # 784 -> 896
    c_pad = _round_up(max(num_classes, 128), 128)      # 10  -> 128

    w1_p = jnp.pad(w1_torch.T.astype(jnp.bfloat16),
                   ((0, d_pad - d_in), (0, 0)))
    w2_p = jnp.pad(w2_torch.T.astype(jnp.bfloat16),
                   ((0, 0), (0, c_pad - num_classes)))
    return w1_p, w2_p, d_in, num_classes


def net_forward_prepared(x_nchw, w1_p, w2_p, d_in, num_classes):
    """Forward pass given pre-padded bf16 weights (see prepare_weights)."""
    B = x_nchw.shape[0]
    x_flat = x_nchw.reshape(B, -1)                     # torch.flatten(x, 1)
    assert x_flat.shape[1] == d_in

    d_pad, hidden = w1_p.shape
    c_pad = w2_p.shape[1]

    tm, b_pad = _pick_batch_tiling(B)
    grid_b = b_pad // tm

    # Fused activation prep: cast to bf16 first, then zero-pad once.
    x_p = jnp.pad(x_flat.astype(jnp.bfloat16),
                  ((0, b_pad - B), (0, d_pad - d_in)))

    cost = pl.CostEstimate(
        flops=2 * b_pad * (d_pad * hidden + hidden * c_pad),
        transcendentals=b_pad * (c_pad + 1),           # exp per lane + log per row
        bytes_accessed=(x_p.size * 2 + w1_p.size * 2 + w2_p.size * 2
                        + b_pad * c_pad * 4),
    )

    out = pl.pallas_call(
        functools.partial(_net_kernel, num_classes=num_classes),
        out_shape=jax.ShapeDtypeStruct((b_pad, c_pad), jnp.float32),
        grid_spec=pltpu.PrefetchScalarGridSpec(
            num_scalar_prefetch=0,
            grid=(grid_b,),
            in_specs=[
                pl.BlockSpec((tm, d_pad), lambda i: (i, 0)),       # x: batch-tiled
                pl.BlockSpec((d_pad, hidden), lambda i: (0, 0)),   # w1: VMEM-resident
                pl.BlockSpec((hidden, c_pad), lambda i: (0, 0)),   # w2: VMEM-resident
            ],
            out_specs=pl.BlockSpec((tm, c_pad), lambda i: (i, 0)),
        ),
        compiler_params=pltpu.CompilerParams(
            dimension_semantics=("parallel",),          # megacore / v7x 2-TC sharding
            vmem_limit_bytes=32 * 1024 * 1024,          # headroom over v5e's 16 MiB default
        ),
        cost_estimate=cost,
    )(x_p, w1_p, w2_p)

    return out[:B, :num_classes]


def net_forward(x_nchw, w1_torch, w2_torch):
    """Convenience wrapper. For repeated inference, hoist prepare_weights()."""
    w1_p, w2_p, d_in, num_classes = prepare_weights(w1_torch, w2_torch)
    return net_forward_prepared(x_nchw, w1_p, w2_p, d_in, num_classes)


def _reference_forward_bf16(x_nchw, w1_torch, w2_torch):
    """Pure-JAX reference using the same bf16-operand / f32-accum scheme."""
    x = x_nchw.reshape(x_nchw.shape[0], -1).astype(jnp.bfloat16)
    h = jnp.dot(x, w1_torch.T.astype(jnp.bfloat16),
                preferred_element_type=jnp.float32)
    h = jnp.maximum(h, 0.0)
    logits = jnp.dot(h.astype(jnp.bfloat16), w2_torch.T.astype(jnp.bfloat16),
                     preferred_element_type=jnp.float32)
    return jax.nn.log_softmax(logits, axis=1)


def _reference_forward_f32(x_nchw, w1_torch, w2_torch):
    """Full-f32 reference (matches the torch module numerics)."""
    x = x_nchw.reshape(x_nchw.shape[0], -1)
    h = jnp.maximum(x @ w1_torch.T, 0.0)
    logits = h @ w2_torch.T
    return jax.nn.log_softmax(logits, axis=1)


if __name__ == "__main__":
    # Shapes implied by the module: flatten -> 784 features, so [B, 1, 28, 28].
    C, H, W = 1, 28, 28
    HIDDEN, NUM_CLASSES = 512, 10

    key = jax.random.PRNGKey(0)
    kx, kw1, kw2, kx2 = jax.random.split(key, 4)

    # Torch-layout weights: fc1.weight [512, 784], fc2.weight [10, 512].
    w1 = jax.random.normal(kw1, (HIDDEN, C * H * W), dtype=jnp.float32) * 0.02
    w2 = jax.random.normal(kw2, (NUM_CLASSES, HIDDEN), dtype=jnp.float32) * 0.02

    # One-time weight prep (hoisted out of the per-call path).
    w1_p, w2_p, d_in, n_cls = prepare_weights(w1, w2)

    # --- small batch: single grid step path --------------------------------
    B = 2
    x = jax.random.normal(kx, (B, C, H, W), dtype=jnp.float32)
    out = net_forward_prepared(x, w1_p, w2_p, d_in, n_cls)
    out = jax.block_until_ready(out)
    assert out.shape == (B, NUM_CLASSES)

    ref_bf16 = _reference_forward_bf16(x, w1, w2)
    ref_f32 = _reference_forward_f32(x, w1, w2)
    assert jnp.allclose(out, ref_bf16, atol=1e-3, rtol=1e-3), "mismatch vs bf16 reference"
    assert jnp.allclose(out, ref_f32, atol=5e-2), "mismatch vs f32 reference"
    assert jnp.allclose(jnp.sum(jnp.exp(out), axis=1), 1.0, atol=1e-4)

    # --- larger batch: exercises the multi-tile 'parallel' grid path -------
    B2 = 600
    x2 = jax.random.normal(kx2, (B2, C, H, W), dtype=jnp.float32)
    out2 = net_forward_prepared(x2, w1_p, w2_p, d_in, n_cls)
    out2 = jax.block_until_ready(out2)
    assert out2.shape == (B2, NUM_CLASSES)
    assert jnp.allclose(out2, _reference_forward_bf16(x2, w1, w2),
                        atol=2e-3, rtol=2e-3), "mismatch vs bf16 reference (large batch)"
    assert jnp.allclose(out2, _reference_forward_f32(x2, w1, w2),
                        atol=5e-2), "mismatch vs f32 reference (large batch)"
    assert jnp.allclose(jnp.sum(jnp.exp(out2), axis=1), 1.0, atol=1e-4)

    print("KERNEL_OK")
</pallas_src>

<mosaic_0001>
module attributes {stable_mosaic.version = 11 : i64} {
  func.func @_net_kernel(%arg0: i32, %arg1: memref<16x896xbf16, #tpu.memory_space<vmem>>, %arg2: memref<896x512xbf16, #tpu.memory_space<vmem>>, %arg3: memref<512x128xbf16, #tpu.memory_space<vmem>>, %arg4: memref<16x128xf32, #tpu.memory_space<vmem>>) attributes {dimension_semantics = [#tpu.dimension_semantics<parallel>], iteration_bounds = array<i64: 1>, scalar_prefetch = 0 : i64, scratch_operands = 0 : i64, tpu.core_type = #tpu.core_type<tc>, window_params = [{transform_indices = @transform_0, window_bounds = array<i64: 16, 896>}, {pipeline_mode = #tpu.pipeline_mode<synchronous>, transform_indices = @transform_1, window_bounds = array<i64: 896, 512>}, {pipeline_mode = #tpu.pipeline_mode<synchronous>, transform_indices = @transform_2, window_bounds = array<i64: 512, 128>}, {transform_indices = @transform_3, window_bounds = array<i64: 16, 128>}]} {
    %c0 = arith.constant 0 : index
    %c0_0 = arith.constant 0 : index
    %0 = vector.load %arg1[%c0, %c0_0] : memref<16x896xbf16, #tpu.memory_space<vmem>>, vector<16x896xbf16>
    %c0_1 = arith.constant 0 : index
    %c0_2 = arith.constant 0 : index
    %1 = vector.load %arg2[%c0_1, %c0_2] : memref<896x512xbf16, #tpu.memory_space<vmem>>, vector<896x512xbf16>
    %cst = arith.constant dense<0.000000e+00> : vector<16x512xf32>
    %2 = tpu.matmul %0, %1, %cst {dimension_numbers = #tpu.dot_dimension_numbers<[1], [0], [0], [1], [0, 0, 1, 1], [], []>} : vector<16x896xbf16>, vector<896x512xbf16>, vector<16x512xf32> -> vector<16x512xf32>
    %cst_3 = arith.constant 0.000000e+00 : f32
    %3 = vector.broadcast %cst_3 : f32 to vector<16x512xf32>
    %4 = arith.maximumf %2, %3 : vector<16x512xf32>
    %5 = arith.truncf %4 : vector<16x512xf32> to vector<16x512xbf16>
    %c0_4 = arith.constant 0 : index
    %c0_5 = arith.constant 0 : index
    %6 = vector.load %arg3[%c0_4, %c0_5] : memref<512x128xbf16, #tpu.memory_space<vmem>>, vector<512x128xbf16>
    %cst_6 = arith.constant dense<0.000000e+00> : vector<16x128xf32>
    %7 = tpu.matmul %5, %6, %cst_6 {dimension_numbers = #tpu.dot_dimension_numbers<[1], [0], [0], [1], [0, 0, 1, 1], [], []>} : vector<16x512xbf16>, vector<512x128xbf16>, vector<16x128xf32> -> vector<16x128xf32>
    %8 = tpu.iota {dimensions = array<i32: 1>} : vector<16x128xi32>
    %c10_i32 = arith.constant 10 : i32
    %9 = vector.broadcast %c10_i32 : i32 to vector<16x128xi32>
    %10 = arith.cmpi slt, %8, %9 : vector<16x128xi32>
    %cst_7 = arith.constant -1.000000e+30 : f32
    %11 = vector.broadcast %cst_7 : f32 to vector<16x128xf32>
    %12 = arith.select %10, %7, %11 : vector<16x128xi1>, vector<16x128xf32>
    %cst_8 = arith.constant dense<0xFF800000> : vector<16xf32>
    %13 = vector.multi_reduction <maximumf>, %12, %cst_8 [1] : vector<16x128xf32> to vector<16xf32>
    %14 = vector.shape_cast %13 : vector<16xf32> to vector<16x1xf32>
    %15 = vector.broadcast %14 : vector<16x1xf32> to vector<16x128xf32>
    %16 = arith.subf %12, %15 : vector<16x128xf32>
    %17 = math.exp %16 : vector<16x128xf32>
    %cst_9 = arith.constant dense<0.000000e+00> : vector<16xf32>
    %18 = vector.multi_reduction <add>, %17, %cst_9 [1] : vector<16x128xf32> to vector<16xf32>
    %19 = vector.shape_cast %18 : vector<16xf32> to vector<16x1xf32>
    %20 = math.log %19 : vector<16x1xf32>
    %21 = vector.broadcast %20 : vector<16x1xf32> to vector<16x128xf32>
    %22 = arith.subf %16, %21 : vector<16x128xf32>
    %c0_10 = arith.constant 0 : index
    %c0_11 = arith.constant 0 : index
    %23 = vector.load %arg4[%c0_10, %c0_11] : memref<16x128xf32, #tpu.memory_space<vmem>>, vector<16x128xf32>
    tpu.vector_store %arg4[%c0_10, %c0_11], %22 {strides = array<i32>} : memref<16x128xf32, #tpu.memory_space<vmem>>, vector<16x128xf32>,
    return
  }
  func.func @transform_0(%arg0: i32) -> (i32, i32) {
    %c0_i32 = arith.constant 0 : i32
    %c0_i32_0 = arith.constant 0 : i32
    return %arg0, %c0_i32 : i32, i32
  }
  func.func @transform_1(%arg0: i32) -> (i32, i32) {
    %c0_i32 = arith.constant 0 : i32
    %c0_i32_0 = arith.constant 0 : i32
    %c0_i32_1 = arith.constant 0 : i32
    return %c0_i32, %c0_i32_0 : i32, i32
  }
  func.func @transform_2(%arg0: i32) -> (i32, i32) {
    %c0_i32 = arith.constant 0 : i32
    %c0_i32_0 = arith.constant 0 : i32
    %c0_i32_1 = arith.constant 0 : i32
    return %c0_i32, %c0_i32_0 : i32, i32
  }
  func.func @transform_3(%arg0: i32) -> (i32, i32) {
    %c0_i32 = arith.constant 0 : i32
    %c0_i32_0 = arith.constant 0 : i32
    return %arg0, %c0_i32 : i32, i32
  }
}

</mosaic_0001>

<bundles_post_ra>
// kernel: tpu_custom_call.1
= control target key start
LH: loop header
LB: loop body
LE: loop exit
PB: predicated region body
PF: predicated region fallthrough
CT: control target
= control target key end

     0   :  { %8 = vsyncpa [#allocation3], 0  ;;  %s3742_s0 = inlined_call_operand.hbm [shape: bf16[16,896], index: 0, kind: input, shape index: {}]   ;;  %s3743_s1 = inlined_call_operand.hbm [shape: bf16[896,512], index: 1, kind: input, shape index: {}]   ;;  %s3744_s2 = inlined_call_operand.hbm [shape: bf16[512,128], index: 2, kind: input, shape index: {}]   ;;  %s3745_s3 = inlined_call_operand.hbm [shape: f32[16,128], index: 3, kind: output, shape index: {}]  }
   0x1   :  { %9 = vsyncpa [#allocation6], 0  ;;  %s28_s14 = sshll.u32 %s3743_s1, 4  ;;  %s29_s14 = int_to_ptr.hbm [resolvable:$true] %s28_s14 }
   0x2   :  { %10 = vsyncpa [#allocation4], 0  ;;  %s3650_s15 = smov [#allocation5]   ;;  %s15_s19 = sshll.u32 %s3742_s0, 4  ;;  %s16_s19 = int_to_ptr.hbm [resolvable:$true] %s15_s19 }
   0x3   :  { %s30_s16 = sshll.u32 %s3650_s15, 4  ;;  %s3651_s20 = smov 256   ;;  %s31_s16 = int_to_ptr.vmem [resolvable:$true] %s30_s16 }
   0x4   :  { %s3652_s21 = smov 16   ;;  %s3653_s22 = smov [#allocation2]  }
   0x5   :  { %36 = dma.hbm_to_vmem [thread:$0]  %s29_s14, 28672, %s31_s16, [#allocation6], %s3651_s20, %s3651_s20, %s3652_s21  }
   0x6   :  { %s17_s23 = sshll.u32 %s3653_s22, 4  ;;  %s3654_s24 = smov 448   ;;  %s18_s23 = int_to_ptr.vmem [resolvable:$true] %s17_s23 }
   0x7   :  { %s3655_s25 = smov 28   ;;  %s41_s27 = sshll.u32 %s3744_s2, 4  ;;  %s42_s27 = int_to_ptr.hbm [resolvable:$true] %s41_s27 }
   0x8   :  { %23 = dma.hbm_to_vmem [thread:$0]  %s16_s19, 896, %s18_s23, [#allocation3], %s3654_s24, %s3654_s24, %s3655_s25  }
   0x9   :  { %s3656_s28 = smov [#allocation7]   ;;  %s3657_s30 = smov 64  }
   0xa   :  { %s43_s29 = sshll.u32 %s3656_s28, 4  ;;  %s3658_s0 = smov 4   ;;  %s44_s29 = int_to_ptr.vmem [resolvable:$true] %s43_s29 }
   0xb   :  { %49 = dma.hbm_to_vmem [thread:$0]  %s42_s27, 4096, %s44_s29, [#allocation6], %s3657_s30, %s3657_s30, %s3658_s0  }
   0xc   :  { %3644 = dma.done.wait [#allocation3], 896  }
   0xd   :  { %3645 = vsyncadd [#allocation3], 4294966400 }
   0xe   :  { %3646 = dma.done.wait [#allocation6], 32768  }
   0xf   :  { %3647 = vsyncadd [#allocation6], 4294934528  ;;  %v2355_v0 = vld [vmem:[#allocation5 + $0xe0] sm:$0xf]  ;;  %v3302_v1 = vld [vmem:[#allocation5 + $0xec] sm:$0xf0] }
  0x10   :  { %v2483_v2 = vld [vmem:[#allocation5 + $0x1e0] sm:$0xf]  ;;  %v2356_v3 = vor.u32 %v3302_v1, %v2355_v0  ;;  %v3334_v4 = vld [vmem:[#allocation5 + $0x1ec] sm:$0xf0]  ;;  %s3659_s2 = smov [#allocation8]   ;;  %s2199_s7 = sshll.u32 %s3745_s3, 4  ;;  %s2200_s7 = int_to_ptr.hbm [resolvable:$true] %s2199_s7 }
  0x11   :  { %v2611_v5 = vld [vmem:[#allocation5 + $0x2e0] sm:$0xf]  ;;  %v3366_v6 = vld [vmem:[#allocation5 + $0x2ec] sm:$0xf0]  ;;  %v2484_v7 = vor.u32 %v3334_v4, %v2483_v2  ;;  %s2197_s4 = sshll.u32 %s3659_s2, 4  ;;  %s3660_s8 = smov 128   ;;  %s2198_s4 = int_to_ptr.vmem [resolvable:$true] %s2197_s4 }
  0x12   :  { %v2612_v8 = vor.u32 %v3366_v6, %v2611_v5  ;;  %v2739_v9 = vld [vmem:[#allocation5 + $0x3e0] sm:$0xf]  ;;  %v3398_v10 = vld [vmem:[#allocation5 + $0x3ec] sm:$0xf0]  ;;  %1450 = vmatpush.bf16.msra.mxu0 %v2356_v3  ;;  %s3661_s9 = smov 8  }
  0x13   :  { %v2339_v11 = vld [vmem:[#allocation5 + $0xc0] sm:$0xf]  ;;  %v2740_v12 = vor.u32 %v3398_v10, %v2739_v9  ;;  %v3298_v13 = vld [vmem:[#allocation5 + $0xcc] sm:$0xf0]  ;;  %1464 = vmatpush.bf16.msra.mxu1 %v2484_v7 }
  0x14   :  { %v2467_v14 = vld [vmem:[#allocation5 + $0x1c0] sm:$0xf]  ;;  %v3330_v15 = vld [vmem:[#allocation5 + $0x1cc] sm:$0xf0]  ;;  %1478 = vmatpush.bf16.msra.mxu2 %v2612_v8  ;;  %v2340_v16 = vor.u32 %v3298_v13, %v2339_v11 }
  0x15   :  { %v2468_v17 = vor.u32 %v3330_v15, %v2467_v14  ;;  %v2595_v18 = vld [vmem:[#allocation5 + $0x2c0] sm:$0xf]  ;;  %v3362_v19 = vld [vmem:[#allocation5 + $0x2cc] sm:$0xf0]  ;;  %1492 = vmatpush.bf16.msra.mxu3 %v2740_v12 }
  0x16   :  { %v2723_v20 = vld [vmem:[#allocation5 + $0x3c0] sm:$0xf]  ;;  %v2596_v21 = vor.u32 %v3362_v19, %v2595_v18  ;;  %v3394_v22 = vld [vmem:[#allocation5 + $0x3cc] sm:$0xf0]  ;;  %1451 = vmatpush.bf16.msra.mxu0 %v2340_v16 }
  0x17   :  { %v2323_v23 = vld [vmem:[#allocation5 + $0xa0] sm:$0xf]  ;;  %v3294_v24 = vld [vmem:[#allocation5 + $0xac] sm:$0xf0]  ;;  %v2724_v25 = vor.u32 %v3394_v22, %v2723_v20  ;;  %1465 = vmatpush.bf16.msra.mxu1 %v2468_v17 }
  0x18   :  { %v2451_v26 = vld [vmem:[#allocation5 + $0x1a0] sm:$0xf]  ;;  %v3326_v27 = vld [vmem:[#allocation5 + $0x1ac] sm:$0xf0]  ;;  %v2324_v29 = vor.u32 %v3294_v24, %v2323_v23  ;;  %1479 = vmatpush.bf16.msra.mxu2 %v2596_v21 }
  0x19   :  { %v2579_v28 = vld [vmem:[#allocation5 + $0x2a0] sm:$0xf]  ;;  %v3358_v30 = vld [vmem:[#allocation5 + $0x2ac] sm:$0xf0]  ;;  %v2452_v33 = vor.u32 %v3326_v27, %v2451_v26  ;;  %1493 = vmatpush.bf16.msra.mxu3 %v2724_v25 }
  0x1a   :  { %v2707_v31 = vld [vmem:[#allocation5 + $0x3a0] sm:$0xf]  ;;  %v3390_v32 = vld [vmem:[#allocation5 + $0x3ac] sm:$0xf0]  ;;  %v2580_v34 = vor.u32 %v3358_v30, %v2579_v28  ;;  %1452 = vmatpush.bf16.msra.mxu0 %v2324_v29 }
  0x1b   :  { %v2307_v35 = vld [vmem:[#allocation5 + $0x80] sm:$0xf]  ;;  %v3290_v36 = vld [vmem:[#allocation5 + $0x8c] sm:$0xf0]  ;;  %v2708_v38 = vor.u32 %v3390_v32, %v2707_v31  ;;  %1466 = vmatpush.bf16.msra.mxu1 %v2452_v33 }
  0x1c   :  { %v2435_v37 = vld [vmem:[#allocation5 + $0x180] sm:$0xf]  ;;  %v3322_v39 = vld [vmem:[#allocation5 + $0x18c] sm:$0xf0]  ;;  %v2308_v44 = vor.u32 %v3290_v36, %v2307_v35  ;;  %1480 = vmatpush.bf16.msra.mxu2 %v2580_v34 }
  0x1d   :  { %v2563_v40 = vld [vmem:[#allocation5 + $0x280] sm:$0xf]  ;;  %v3354_v41 = vld [vmem:[#allocation5 + $0x28c] sm:$0xf0]  ;;  %v2436_v45 = vor.u32 %v3322_v39, %v2435_v37  ;;  %1494 = vmatpush.bf16.msra.mxu3 %v2708_v38  ;;  %v3300_v37 = vld [vmem:[#allocation5 + $0xe4] sm:$0xf] }
  0x1e   :  { %v2691_v42 = vld [vmem:[#allocation5 + $0x380] sm:$0xf]  ;;  %v3386_v43 = vld [vmem:[#allocation5 + $0x38c] sm:$0xf0]  ;;  %v2564_v46 = vor.u32 %v3354_v41, %v2563_v40  ;;  %1453 = vmatpush.bf16.msra.mxu0 %v2308_v44  ;;  %v2357_v38 = vld [vmem:[#allocation5 + $0xf0] sm:$0xf0] }
  0x1f   :  { %v2291_v47 = vld [vmem:[#allocation5 + $0x60] sm:$0xf]  ;;  %v3286_v48 = vld [vmem:[#allocation5 + $0x6c] sm:$0xf0]  ;;  %v2692_v50 = vor.u32 %v3386_v43, %v2691_v42  ;;  %1467 = vmatpush.bf16.msra.mxu1 %v2436_v45 }
  0x20   :  { %v2419_v49 = vld [vmem:[#allocation5 + $0x160] sm:$0xf]  ;;  %v3318_v51 = vld [vmem:[#allocation5 + $0x16c] sm:$0xf0]  ;;  %v2292_v56 = vor.u32 %v3286_v48, %v2291_v47  ;;  %1481 = vmatpush.bf16.msra.mxu2 %v2564_v46  ;;  %v2360_v48 = vor.u32 %v3300_v37, %v2357_v38 }
  0x21   :  { %v2547_v52 = vld [vmem:[#allocation5 + $0x260] sm:$0xf]  ;;  %v3350_v53 = vld [vmem:[#allocation5 + $0x26c] sm:$0xf0]  ;;  %v2420_v57 = vor.u32 %v3318_v51, %v2419_v49  ;;  %1495 = vmatpush.bf16.msra.mxu3 %v2692_v50  ;;  %v3296_v50 = vld [vmem:[#allocation5 + $0xc4] sm:$0xf] }
  0x22   :  { %v2675_v54 = vld [vmem:[#allocation5 + $0x360] sm:$0xf]  ;;  %v3382_v55 = vld [vmem:[#allocation5 + $0x36c] sm:$0xf0]  ;;  %v2548_v58 = vor.u32 %v3350_v53, %v2547_v52  ;;  %1454 = vmatpush.bf16.msra.mxu0 %v2292_v56  ;;  %v2341_v51 = vld [vmem:[#allocation5 + $0xd0] sm:$0xf0] }
  0x23   :  { %v2275_v59 = vld [vmem:[#allocation5 + $0x40] sm:$0xf]  ;;  %v3282_v60 = vld [vmem:[#allocation5 + $0x4c] sm:$0xf0]  ;;  %v2676_v62 = vor.u32 %v3382_v55, %v2675_v54  ;;  %1468 = vmatpush.bf16.msra.mxu1 %v2420_v57  ;;  %v2215_v52 = vld [vmem:[#allocation2] sm:$0xf] }
  0x24   :  { %v2403_v61 = vld [vmem:[#allocation5 + $0x140] sm:$0xf]  ;;  %v3314_v63 = vld [vmem:[#allocation5 + $0x14c] sm:$0xf0]  ;;  %v2276_v4 = vor.u32 %v3282_v60, %v2275_v59  ;;  %1482 = vmatpush.bf16.msra.mxu2 %v2548_v58  ;;  %v3268_v53 = vld [vmem:[#allocation2 + $0x18] sm:$0xf0] }
  0x25   :  { %v2531_v0 = vld [vmem:[#allocation5 + $0x240] sm:$0xf]  ;;  %v3346_v1 = vld [vmem:[#allocation5 + $0x24c] sm:$0xf0]  ;;  %v2404_v5 = vor.u32 %v3314_v63, %v2403_v61  ;;  %1496 = vmatpush.bf16.msra.mxu3 %v2676_v62  ;;  %v3691_v57 = vor.u32 %v3268_v53, %v2215_v52  ;;  %v3269_v58 = vld [vmem:[#allocation2 + $0x20] sm:$0xf0] }
  0x26   :  { %v2659_v2 = vld [vmem:[#allocation5 + $0x340] sm:$0xf]  ;;  %v3378_v3 = vld [vmem:[#allocation5 + $0x34c] sm:$0xf0]  ;;  %v2532_v6 = vor.u32 %v3346_v1, %v2531_v0  ;;  %1455 = vmatpush.bf16.msra.mxu0 %v2276_v4  ;;  %v2344_v1 = vor.u32 %v3296_v50, %v2341_v51  ;;  %v3292_v4 = vld [vmem:[#allocation5 + $0xa4] sm:$0xf] }
  0x27   :  { %v2259_v7 = vld [vmem:[#allocation5 + $0x20] sm:$0xf]  ;;  %v3278_v8 = vld [vmem:[#allocation5 + $0x2c] sm:$0xf0]  ;;  %v2660_v10 = vor.u32 %v3378_v3, %v2659_v2  ;;  %1469 = vmatpush.bf16.msra.mxu1 %v2404_v5  ;;  %v2325_v5 = vld [vmem:[#allocation5 + $0xb0] sm:$0xf0] }
  0x28   :  { %v2387_v9 = vld [vmem:[#allocation5 + $0x120] sm:$0xf]  ;;  %v3310_v11 = vld [vmem:[#allocation5 + $0x12c] sm:$0xf0]  ;;  %v2260_v16 = vor.u32 %v3278_v8, %v2259_v7  ;;  %1483 = vmatpush.bf16.msra.mxu2 %v2532_v6  ;;  %v3265_v6 = vld [vmem:[#allocation2 + $0x4] sm:$0xf] }
  0x29   :  { %v2515_v12 = vld [vmem:[#allocation5 + $0x220] sm:$0xf]  ;;  %v3342_v13 = vld [vmem:[#allocation5 + $0x22c] sm:$0xf0]  ;;  %v2388_v19 = vor.u32 %v3310_v11, %v2387_v9  ;;  %1497 = vmatpush.bf16.msra.mxu3 %v2660_v10  ;;  %v2217_v7 = vld [vmem:[#allocation2 + $0x1c] sm:$0xf0] }
  0x2a   :  { %v2643_v14 = vld [vmem:[#allocation5 + $0x320] sm:$0xf]  ;;  %v3374_v15 = vld [vmem:[#allocation5 + $0x32c] sm:$0xf0]  ;;  %v2516_v20 = vor.u32 %v3342_v13, %v2515_v12  ;;  %1456 = vmatpush.bf16.msra.mxu0 %v2260_v16  ;;  %v3697_v11 = vor.u32 %v3265_v6, %v2217_v7  ;;  %v3272_v7 = vld [vmem:[#allocation5 + $0x4] sm:$0xf] }
  0x2b   :  { %v2243_v17 = vld [vmem:[#allocation5] sm:$0xf]  ;;  %v3274_v18 = vld [vmem:[#allocation5 + $0xc] sm:$0xf0]  ;;  %v2644_v24 = vor.u32 %v3374_v15, %v2643_v14  ;;  %1470 = vmatpush.bf16.msra.mxu1 %v2388_v19  ;;  %v3266_v19 = vld [vmem:[#allocation2 + $0xc] sm:$0xf] }
  0x2c   :  { %v2371_v21 = vld [vmem:[#allocation5 + $0x100] sm:$0xf]  ;;  %v3306_v22 = vld [vmem:[#allocation5 + $0x10c] sm:$0xf0]  ;;  %v2244_v31 = vor.u32 %v3274_v18, %v2243_v17  ;;  %1484 = vmatpush.bf16.msra.mxu2 %v2516_v20  ;;  %v2328_v17 = vor.u32 %v3292_v4, %v2325_v5 }
  0x2d   :  { %v2499_v23 = vld [vmem:[#allocation5 + $0x200] sm:$0xf]  ;;  %v3338_v25 = vld [vmem:[#allocation5 + $0x20c] sm:$0xf0]  ;;  %v2372_v35 = vor.u32 %v3306_v22, %v2371_v21  ;;  %1498 = vmatpush.bf16.msra.mxu3 %v2644_v24  ;;  %v3288_v21 = vld [vmem:[#allocation5 + $0x84] sm:$0xf] }
  0x2e   :  { %v2627_v26 = vld [vmem:[#allocation5 + $0x300] sm:$0xf]  ;;  %v3370_v27 = vld [vmem:[#allocation5 + $0x30c] sm:$0xf0]  ;;  %v2500_v36 = vor.u32 %v3338_v25, %v2499_v23  ;;  %1457 = vmatpush.bf16.msra.mxu0 %v2244_v31  ;;  %v2309_v22 = vld [vmem:[#allocation5 + $0x90] sm:$0xf0] }
  0x2f   :  { %v2867_v28 = vld [vmem:[#allocation5 + $0x4e0] sm:$0xf]  ;;  %v3430_v29 = vld [vmem:[#allocation5 + $0x4ec] sm:$0xf0]  ;;  %v2628_v39 = vor.u32 %v3370_v27, %v2627_v26  ;;  %1471 = vmatpush.bf16.msra.mxu1 %v2372_v35  ;;  %v2293_v35 = vld [vmem:[#allocation5 + $0x70] sm:$0xf0] }
  0x30   :  { %v2995_v30 = vld [vmem:[#allocation5 + $0x5e0] sm:$0xf]  ;;  %v3462_v32 = vld [vmem:[#allocation5 + $0x5ec] sm:$0xf0]  ;;  %v2868_v40 = vor.u32 %v3430_v29, %v2867_v28  ;;  %1485 = vmatpush.bf16.msra.mxu2 %v2500_v36 }
  0x31   :  { %v3123_v33 = vld [vmem:[#allocation5 + $0x6e0] sm:$0xf]  ;;  %v3494_v34 = vld [vmem:[#allocation5 + $0x6ec] sm:$0xf0]  ;;  %v2996_v43 = vor.u32 %v3462_v32, %v2995_v30  ;;  %1499 = vmatpush.bf16.msra.mxu3 %v2628_v39  ;;  %1458 = vmatmul.bf16.vlgmr.msra.gmra.mxu0 %v3691_v57  ;;  %v2312_v30 = vor.u32 %v3288_v21, %v2309_v22  ;;  %v2231_v22 = vld [vmem:[#allocation2 + $0x10] sm:$0xf] }
  0x32   :  { %v2851_v41 = vld [vmem:[#allocation5 + $0x4c0] sm:$0xf]  ;;  %v3426_v42 = vld [vmem:[#allocation5 + $0x4cc] sm:$0xf0]  ;;  %v3124_v44 = vor.u32 %v3494_v34, %v3123_v33  ;;  %1506 = vmatpush.bf16.msrb.mxu0 %v2868_v40  ;;  %1472 = vmatmul.bf16.vlgmr.msra.gmra.mxu1 %v3697_v11  ;;  %v3284_v34 = vld [vmem:[#allocation5 + $0x64] sm:$0xf] }
  0x33   :  { %v2979_v45 = vld [vmem:[#allocation5 + $0x5c0] sm:$0xf]  ;;  %v3458_v46 = vld [vmem:[#allocation5 + $0x5cc] sm:$0xf0]  ;;  %v2852_v55 = vor.u32 %v3426_v42, %v2851_v41  ;;  %1520 = vmatpush.bf16.msrb.mxu1 %v2996_v43  ;;  %v2296_v42 = vor.u32 %v3284_v34, %v2293_v35  ;;  %v2469_v34 = vld [vmem:[#allocation5 + $0x1d0] sm:$0xf0] }
  0x34   :  { %v3107_v47 = vld [vmem:[#allocation5 + $0x6c0] sm:$0xf]  ;;  %v3490_v49 = vld [vmem:[#allocation5 + $0x6cc] sm:$0xf0]  ;;  %1534 = vmatpush.bf16.msrb.mxu2 %v3124_v44  ;;  %v2980_v59 = vor.u32 %v3458_v46, %v2979_v45  ;;  %v3280_v46 = vld [vmem:[#allocation5 + $0x44] sm:$0xf] }
  0x35   :  { %v2223_v54 = vld [vmem:[#allocation2 + $0x8] sm:$0xf]  ;;  %v2835_v56 = vld [vmem:[#allocation5 + $0x4a0] sm:$0xf]  ;;  %v3108_v60 = vor.u32 %v3490_v49, %v3107_v47  ;;  %1548 = vmatpush.bf16.msrb.mxu3 %v2360_v48  ;;  %v2277_v47 = vld [vmem:[#allocation5 + $0x50] sm:$0xf0] }
  0x36   :  { %v3422_v61 = vld [vmem:[#allocation5 + $0x4ac] sm:$0xf0]  ;;  %v2963_v62 = vld [vmem:[#allocation5 + $0x5a0] sm:$0xf]  ;;  %v3693_v0 = vor.u32 %v3269_v58, %v2223_v54  ;;  %1507 = vmatpush.bf16.msrb.mxu0 %v2852_v55  ;;  %v2280_v54 = vor.u32 %v3280_v46, %v2277_v47  ;;  %v3360_v35 = vld [vmem:[#allocation5 + $0x2c4] sm:$0xf] }
  0x37   :  { %v3454_v63 = vld [vmem:[#allocation5 + $0x5ac] sm:$0xf0]  ;;  %v3091_v2 = vld [vmem:[#allocation5 + $0x6a0] sm:$0xf]  ;;  %v2836_v8 = vor.u32 %v3422_v61, %v2835_v56  ;;  %1521 = vmatpush.bf16.msrb.mxu1 %v2980_v59  ;;  %v3276_v59 = vld [vmem:[#allocation5 + $0x24] sm:$0xf] }
  0x38   :  { %v3486_v3 = vld [vmem:[#allocation5 + $0x6ac] sm:$0xf0]  ;;  %1486 = vmatmul.bf16.vlgmr.msra.gmra.mxu2 %v3693_v0  ;;  %v2819_v9 = vld [vmem:[#allocation5 + $0x480] sm:$0xf]  ;;  %v2964_v12 = vor.u32 %v3454_v63, %v2963_v62 }
  0x39   :  { %v3418_v10 = vld [vmem:[#allocation5 + $0x48c] sm:$0xf0]  ;;  %1535 = vmatpush.bf16.msrb.mxu2 %v3108_v60  ;;  %v3092_v13 = vor.u32 %v3486_v3, %v3091_v2  ;;  %v2947_v14 = vld [vmem:[#allocation5 + $0x580] sm:$0xf]  ;;  %1549 = vmatpush.bf16.msrb.mxu3 %v2344_v1  ;;  %v2261_v60 = vld [vmem:[#allocation5 + $0x30] sm:$0xf0] }
  0x3a   :  { %v3450_v15 = vld [vmem:[#allocation5 + $0x58c] sm:$0xf0]  ;;  %v3075_v16 = vld [vmem:[#allocation5 + $0x680] sm:$0xf]  ;;  %1508 = vmatpush.bf16.msrb.mxu0 %v2836_v8  ;;  %v2820_v24 = vor.u32 %v3418_v10, %v2819_v9  ;;  %v2264_v8 = vor.u32 %v3276_v59, %v2261_v60  ;;  %v2245_v9 = vld [vmem:[#allocation5 + $0x10] sm:$0xf0] }
  0x3b   :  { %v3482_v18 = vld [vmem:[#allocation5 + $0x68c] sm:$0xf0]  ;;  %1522 = vmatpush.bf16.msrb.mxu1 %v2964_v12  ;;  %v2948_v25 = vor.u32 %v3450_v15, %v2947_v14  ;;  %v2803_v27 = vld [vmem:[#allocation5 + $0x460] sm:$0xf]  ;;  %v3332_v10 = vld [vmem:[#allocation5 + $0x1e4] sm:$0xf] }
  0x3c   :  { %v2225_v20 = vld [vmem:[#allocation2 + $0x24] sm:$0xf0]  ;;  %v3076_v26 = vor.u32 %v3482_v18, %v3075_v16  ;;  %v2931_v29 = vld [vmem:[#allocation5 + $0x560] sm:$0xf]  ;;  %v2485_v12 = vld [vmem:[#allocation5 + $0x1f0] sm:$0xf0] }
  0x3d   :  { %v3700_v23 = vor.u32 %v3266_v19, %v2225_v20  ;;  %1536 = vmatpush.bf16.msrb.mxu2 %v3092_v13  ;;  %v3414_v28 = vld [vmem:[#allocation5 + $0x46c] sm:$0xf0]  ;;  %1550 = vmatpush.bf16.msrb.mxu3 %v2328_v17  ;;  %v3059_v32 = vld [vmem:[#allocation5 + $0x660] sm:$0xf]  ;;  %v3364_v13 = vld [vmem:[#allocation5 + $0x2e4] sm:$0xf] }
  0x3e   :  { %v3446_v31 = vld [vmem:[#allocation5 + $0x56c] sm:$0xf0]  ;;  %1509 = vmatpush.bf16.msrb.mxu0 %v2820_v24  ;;  %v2804_v36 = vor.u32 %v3414_v28, %v2803_v27  ;;  %v2787_v39 = vld [vmem:[#allocation5 + $0x440] sm:$0xf]  ;;  %v2613_v14 = vld [vmem:[#allocation5 + $0x2f0] sm:$0xf0]  ;;  %v2488_v27 = vor.u32 %v3332_v10, %v2485_v12 }
  0x3f   :  { %v3478_v33 = vld [vmem:[#allocation5 + $0x66c] sm:$0xf0]  ;;  %1500 = vmatmul.bf16.vlgmr.msra.gmra.mxu3 %v3700_v23  ;;  %1523 = vmatpush.bf16.msrb.mxu1 %v2948_v25  ;;  %v2932_v37 = vor.u32 %v3446_v31, %v2931_v29  ;;  %v2915_v41 = vld [vmem:[#allocation5 + $0x540] sm:$0xf]  ;;  %v3396_v15 = vld [vmem:[#allocation5 + $0x3e4] sm:$0xf]  ;;  %v2616_v31 = vor.u32 %v3364_v13, %v2613_v14 }
  0x40   :  { %v3060_v38 = vor.u32 %v3478_v33, %v3059_v32  ;;  %v3410_v40 = vld [vmem:[#allocation5 + $0x44c] sm:$0xf0]  ;;  %v3043_v44 = vld [vmem:[#allocation5 + $0x640] sm:$0xf]  ;;  %v2741_v17 = vld [vmem:[#allocation5 + $0x3f0] sm:$0xf0] }
  0x41   :  { %1537 = vmatpush.bf16.msrb.mxu2 %v3076_v26  ;;  %1551 = vmatpush.bf16.msrb.mxu3 %v2312_v30  ;;  %v3442_v43 = vld [vmem:[#allocation5 + $0x54c] sm:$0xf0]  ;;  %v2788_v48 = vor.u32 %v3410_v40, %v2787_v39  ;;  %v2771_v51 = vld [vmem:[#allocation5 + $0x420] sm:$0xf]  ;;  %v3428_v18 = vld [vmem:[#allocation5 + $0x4e4] sm:$0xf]  ;;  %v2248_v26 = vor.u32 %v3272_v7, %v2245_v9  ;;  %v2744_v32 = vor.u32 %v3396_v15, %v2741_v17 }
  0x42   :  { %v3474_v45 = vld [vmem:[#allocation5 + $0x64c] sm:$0xf0]  ;;  %1510 = vmatpush.bf16.msrb.mxu0 %v2804_v36  ;;  %v2916_v49 = vor.u32 %v3442_v43, %v2915_v41  ;;  %v2899_v53 = vld [vmem:[#allocation5 + $0x520] sm:$0xf]  ;;  %v2869_v19 = vld [vmem:[#allocation5 + $0x4f0] sm:$0xf0] }
  0x43   :  { %1524 = vmatpush.bf16.msrb.mxu1 %v2932_v37  ;;  %v3044_v50 = vor.u32 %v3474_v45, %v3043_v44  ;;  %v3406_v52 = vld [vmem:[#allocation5 + $0x42c] sm:$0xf0]  ;;  %v3027_v56 = vld [vmem:[#allocation5 + $0x620] sm:$0xf]  ;;  %v3270_v24 = vld [vmem:[#allocation2 + $0x28] sm:$0xf0]  ;;  %v2872_v36 = vor.u32 %v3428_v18, %v2869_v19 }
  0x44   :  { %v3438_v55 = vld [vmem:[#allocation5 + $0x52c] sm:$0xf0]  ;;  %v2755_v61 = vld [vmem:[#allocation5 + $0x400] sm:$0xf]  ;;  %v2772_v62 = vor.u32 %v3406_v52, %v2771_v51  ;;  %v3271_v28 = vld [vmem:[#allocation2 + $0x30] sm:$0xf0]  ;;  %v3703_v37 = vor.u32 %v3270_v24, %v2231_v22 }
  0x45   :  { %1538 = vmatpush.bf16.msrb.mxu2 %v3060_v38  ;;  %1552 = vmatpush.bf16.msrb.mxu3 %v2296_v42  ;;  %v3470_v58 = vld [vmem:[#allocation5 + $0x62c] sm:$0xf0]  ;;  %v2883_v1 = vld [vmem:[#allocation5 + $0x500] sm:$0xf]  ;;  %v2900_v3 = vor.u32 %v3438_v55, %v2899_v53  ;;  %v3267_v29 = vld [vmem:[#allocation2 + $0x14] sm:$0xf] }
  0x46   :  { %1511 = vmatpush.bf16.msrb.mxu0 %v2788_v48  ;;  %v3402_v63 = vld [vmem:[#allocation5 + $0x40c] sm:$0xf0]  ;;  %v3028_v4 = vor.u32 %v3470_v58, %v3027_v56  ;;  %v3011_v5 = vld [vmem:[#allocation5 + $0x600] sm:$0xf]  ;;  %v2233_v30 = vld [vmem:[#allocation2 + $0x2c] sm:$0xf0] }
  0x47   :  { %v3434_v2 = vld [vmem:[#allocation5 + $0x50c] sm:$0xf0]  ;;  %1525 = vmatpush.bf16.msrb.mxu1 %v2916_v49  ;;  %v2756_v16 = vor.u32 %v3402_v63, %v2755_v61  ;;  %v2239_v25 = vld [vmem:[#allocation2 + $0x18] sm:$0xf]  ;;  %v3328_v33 = vld [vmem:[#allocation5 + $0x1c4] sm:$0xf]  ;;  %v3707_v42 = vor.u32 %v3267_v29, %v2233_v30 }
  0x48   :  { %v3466_v6 = vld [vmem:[#allocation5 + $0x60c] sm:$0xf0]  ;;  %v2884_v20 = vor.u32 %v3434_v2, %v2883_v1  ;;  %v2597_v38 = vld [vmem:[#allocation5 + $0x2d0] sm:$0xf0]  ;;  %v3392_v39 = vld [vmem:[#allocation5 + $0x3c4] sm:$0xf]  ;;  %v3705_v41 = vor.u32 %v3271_v28, %v2239_v25  ;;  %v2472_v45 = vor.u32 %v3328_v33, %v2469_v34 }
  0x49   :  { %1539 = vmatpush.bf16.msrb.mxu2 %v3044_v50  ;;  %1553 = vmatpush.bf16.msrb.mxu3 %v2280_v54  ;;  %v3012_v21 = vor.u32 %v3466_v6, %v3011_v5  ;;  %v2725_v40 = vld [vmem:[#allocation5 + $0x3d0] sm:$0xf0]  ;;  %v3424_v43 = vld [vmem:[#allocation5 + $0x4c4] sm:$0xf]  ;;  %v2600_v46 = vor.u32 %v3360_v35, %v2597_v38 }
  0x4a   :  { %1512 = vmatpush.bf16.msrb.mxu0 %v2772_v62  ;;  %v2853_v44 = vld [vmem:[#allocation5 + $0x4d0] sm:$0xf0]  ;;  %v2728_v47 = vor.u32 %v3392_v39, %v2725_v40  ;;  %v3324_v48 = vld [vmem:[#allocation5 + $0x1a4] sm:$0xf] }
  0x4b   :  { %1526 = vmatpush.bf16.msrb.mxu1 %v2900_v3  ;;  %v2453_v49 = vld [vmem:[#allocation5 + $0x1b0] sm:$0xf0]  ;;  %v3356_v50 = vld [vmem:[#allocation5 + $0x2a4] sm:$0xf]  ;;  %v2856_v51 = vor.u32 %v3424_v43, %v2853_v44 }
  0x4c   :  { %v2581_v52 = vld [vmem:[#allocation5 + $0x2b0] sm:$0xf0]  ;;  %v3388_v53 = vld [vmem:[#allocation5 + $0x3a4] sm:$0xf]  ;;  %v2456_v58 = vor.u32 %v3324_v48, %v2453_v49 }
  0x4d   :  { %1540 = vmatpush.bf16.msrb.mxu2 %v3028_v4  ;;  %1554 = vmatpush.bf16.msrb.mxu3 %v2264_v8  ;;  %v2709_v54 = vld [vmem:[#allocation5 + $0x3b0] sm:$0xf0]  ;;  %v3420_v55 = vld [vmem:[#allocation5 + $0x4a4] sm:$0xf]  ;;  %v2584_v59 = vor.u32 %v3356_v50, %v2581_v52 }
  0x4e   :  { %1513 = vmatpush.bf16.msrb.mxu0 %v2756_v16  ;;  %v2837_v56 = vld [vmem:[#allocation5 + $0x4b0] sm:$0xf0]  ;;  %v2712_v60 = vor.u32 %v3388_v53, %v2709_v54  ;;  %v3320_v61 = vld [vmem:[#allocation5 + $0x184] sm:$0xf] }
  0x4f   :  { %1527 = vmatpush.bf16.msrb.mxu1 %v2884_v20  ;;  %v2437_v62 = vld [vmem:[#allocation5 + $0x190] sm:$0xf0]  ;;  %v3352_v63 = vld [vmem:[#allocation5 + $0x284] sm:$0xf]  ;;  %v2840_v1 = vor.u32 %v3420_v55, %v2837_v56 }
  0x50   :  { %v2565_v2 = vld [vmem:[#allocation5 + $0x290] sm:$0xf0]  ;;  %v3384_v3 = vld [vmem:[#allocation5 + $0x384] sm:$0xf]  ;;  %v2440_v7 = vor.u32 %v3320_v61, %v2437_v62 }
  0x51   :  { %1541 = vmatpush.bf16.msrb.mxu2 %v3012_v21  ;;  %1555 = vmatpush.bf16.msrb.mxu3 %v2248_v26  ;;  %v2693_v4 = vld [vmem:[#allocation5 + $0x390] sm:$0xf0]  ;;  %v3416_v5 = vld [vmem:[#allocation5 + $0x484] sm:$0xf]  ;;  %v2568_v8 = vor.u32 %v3352_v63, %v2565_v2 }
  0x52   :  { %1562 = vmatpush.bf16.msra.mxu0 %v2488_v27  ;;  %1528 = vmatmul.bf16.vlgmr.msrb.gmra.mxu1 %v3707_v42  ;;  %v2821_v6 = vld [vmem:[#allocation5 + $0x490] sm:$0xf0]  ;;  %v2696_v9 = vor.u32 %v3384_v3, %v2693_v4  ;;  %v3316_v10 = vld [vmem:[#allocation5 + $0x164] sm:$0xf]  ;;  %v2363_v3 = vld [vmem:[#allocation5 + $0xe8] sm:$0xf] }
  0x53   :  { %1576 = vmatpush.bf16.msra.mxu1 %v2616_v31  ;;  %1514 = vmatmul.bf16.vlgmr.msrb.gmra.mxu0 %v3703_v37  ;;  %v2421_v12 = vld [vmem:[#allocation5 + $0x170] sm:$0xf0]  ;;  %v3348_v13 = vld [vmem:[#allocation5 + $0x264] sm:$0xf]  ;;  %v2824_v14 = vor.u32 %v3416_v5, %v2821_v6  ;;  %v3303_v4 = vld [vmem:[#allocation5 + $0xf4] sm:$0xf0] }
  0x54   :  { %1542 = vmatmul.bf16.vlgmr.msrb.gmra.mxu2 %v3705_v41  ;;  %1556 = vmatmul.bf16.vlgmr.msrb.gmra.mxu3 %v3691_v57  ;;  %v2549_v15 = vld [vmem:[#allocation5 + $0x270] sm:$0xf0]  ;;  %v3380_v16 = vld [vmem:[#allocation5 + $0x364] sm:$0xf]  ;;  %v2424_v20 = vor.u32 %v3316_v10, %v2421_v12 }
  0x55   :  { %1590 = vmatpush.bf16.msra.mxu2 %v2744_v32  ;;  %1604 = vmatpush.bf16.msra.mxu3 %v2872_v36  ;;  %v2677_v17 = vld [vmem:[#allocation5 + $0x370] sm:$0xf0]  ;;  %v3412_v18 = vld [vmem:[#allocation5 + $0x464] sm:$0xf]  ;;  %v2552_v21 = vor.u32 %v3348_v13, %v2549_v15  ;;  %v2364_v13 = vor.u32 %v3303_v4, %v2363_v3 }
  0x56   :  { %1563 = vmatpush.bf16.msra.mxu0 %v2472_v45  ;;  %v2805_v19 = vld [vmem:[#allocation5 + $0x470] sm:$0xf0]  ;;  %v2680_v22 = vor.u32 %v3380_v16, %v2677_v17  ;;  %v3312_v24 = vld [vmem:[#allocation5 + $0x144] sm:$0xf] }
  0x57   :  { %1577 = vmatpush.bf16.msra.mxu1 %v2600_v46  ;;  %v2405_v25 = vld [vmem:[#allocation5 + $0x150] sm:$0xf0]  ;;  %v3344_v26 = vld [vmem:[#allocation5 + $0x244] sm:$0xf]  ;;  %v2808_v27 = vor.u32 %v3412_v18, %v2805_v19  ;;  %v2347_v19 = vld [vmem:[#allocation5 + $0xc8] sm:$0xf] }
  0x58   :  { %v2533_v28 = vld [vmem:[#allocation5 + $0x250] sm:$0xf0]  ;;  %v3376_v29 = vld [vmem:[#allocation5 + $0x344] sm:$0xf]  ;;  %v2408_v33 = vor.u32 %v3312_v24, %v2405_v25 }
  0x59   :  { %1591 = vmatpush.bf16.msra.mxu2 %v2728_v47  ;;  %1605 = vmatpush.bf16.msra.mxu3 %v2856_v51  ;;  %v2661_v30 = vld [vmem:[#allocation5 + $0x350] sm:$0xf0]  ;;  %v3408_v31 = vld [vmem:[#allocation5 + $0x444] sm:$0xf]  ;;  %v2536_v34 = vor.u32 %v3344_v26, %v2533_v28 }
  0x5a   :  { %1564 = vmatpush.bf16.msra.mxu0 %v2456_v58  ;;  %v2789_v32 = vld [vmem:[#allocation5 + $0x450] sm:$0xf0]  ;;  %v2664_v35 = vor.u32 %v3376_v29, %v2661_v30  ;;  %v3308_v36 = vld [vmem:[#allocation5 + $0x124] sm:$0xf] }
  0x5b   :  { %1578 = vmatpush.bf16.msra.mxu1 %v2584_v59  ;;  %v2389_v38 = vld [vmem:[#allocation5 + $0x130] sm:$0xf0]  ;;  %v3340_v39 = vld [vmem:[#allocation5 + $0x224] sm:$0xf]  ;;  %v2792_v40 = vor.u32 %v3408_v31, %v2789_v32  ;;  %v2331_v32 = vld [vmem:[#allocation5 + $0xa8] sm:$0xf] }
  0x5c   :  { %v2517_v43 = vld [vmem:[#allocation5 + $0x230] sm:$0xf0]  ;;  %v3372_v44 = vld [vmem:[#allocation5 + $0x324] sm:$0xf]  ;;  %v2392_v48 = vor.u32 %v3308_v36, %v2389_v38 }
  0x5d   :  { %1592 = vmatpush.bf16.msra.mxu2 %v2712_v60  ;;  %1606 = vmatpush.bf16.msra.mxu3 %v2840_v1  ;;  %v2645_v45 = vld [vmem:[#allocation5 + $0x330] sm:$0xf0]  ;;  %v3404_v46 = vld [vmem:[#allocation5 + $0x424] sm:$0xf]  ;;  %v2520_v51 = vor.u32 %v3340_v39, %v2517_v43 }
  0x5e   :  { %1565 = vmatpush.bf16.msra.mxu0 %v2440_v7  ;;  %v2773_v47 = vld [vmem:[#allocation5 + $0x430] sm:$0xf0]  ;;  %v3304_v49 = vld [vmem:[#allocation5 + $0x104] sm:$0xf]  ;;  %v2648_v52 = vor.u32 %v3372_v44, %v2645_v45  ;;  %v2491_v7 = vld [vmem:[#allocation5 + $0x1e8] sm:$0xf] }
  0x5f   :  { %1579 = vmatpush.bf16.msra.mxu1 %v2568_v8  ;;  %v2373_v50 = vld [vmem:[#allocation5 + $0x110] sm:$0xf0]  ;;  %v3336_v53 = vld [vmem:[#allocation5 + $0x204] sm:$0xf]  ;;  %v2776_v56 = vor.u32 %v3404_v46, %v2773_v47  ;;  %v3335_v8 = vld [vmem:[#allocation5 + $0x1f4] sm:$0xf0] }
  0x60   :  { %v2501_v54 = vld [vmem:[#allocation5 + $0x210] sm:$0xf0]  ;;  %v3368_v55 = vld [vmem:[#allocation5 + $0x304] sm:$0xf]  ;;  %v2376_v1 = vor.u32 %v3304_v49, %v2373_v50  ;;  %v2492_v17 = vor.u32 %v3335_v8, %v2491_v7  ;;  %v2315_v47 = vld [vmem:[#allocation5 + $0x88] sm:$0xf] }
  0x61   :  { %1593 = vmatpush.bf16.msra.mxu2 %v2696_v9  ;;  %1607 = vmatpush.bf16.msra.mxu3 %v2824_v14  ;;  %v2629_v58 = vld [vmem:[#allocation5 + $0x310] sm:$0xf0]  ;;  %v3400_v59 = vld [vmem:[#allocation5 + $0x404] sm:$0xf]  ;;  %v2504_v5 = vor.u32 %v3336_v53, %v2501_v54  ;;  %v2443_v49 = vld [vmem:[#allocation5 + $0x188] sm:$0xf] }
  0x62   :  { %1566 = vmatpush.bf16.msra.mxu0 %v2424_v20  ;;  %v2757_v60 = vld [vmem:[#allocation5 + $0x410] sm:$0xf0]  ;;  %v3460_v61 = vld [vmem:[#allocation5 + $0x5e4] sm:$0xf]  ;;  %v2632_v6 = vor.u32 %v3368_v55, %v2629_v58  ;;  %v3299_v20 = vld [vmem:[#allocation5 + $0xd4] sm:$0xf0] }
  0x63   :  { %1580 = vmatpush.bf16.msra.mxu1 %v2552_v21  ;;  %v2997_v62 = vld [vmem:[#allocation5 + $0x5f0] sm:$0xf0]  ;;  %v3492_v63 = vld [vmem:[#allocation5 + $0x6e4] sm:$0xf]  ;;  %v2760_v9 = vor.u32 %v3400_v59, %v2757_v60  ;;  %v2475_v21 = vld [vmem:[#allocation5 + $0x1c8] sm:$0xf]  ;;  %v2348_v26 = vor.u32 %v3299_v20, %v2347_v19 }
  0x64   :  { %v3125_v2 = vld [vmem:[#allocation5 + $0x6f0] sm:$0xf0]  ;;  %v3000_v10 = vor.u32 %v3460_v61, %v2997_v62  ;;  %v3456_v14 = vld [vmem:[#allocation5 + $0x5c4] sm:$0xf]  ;;  %v3323_v50 = vld [vmem:[#allocation5 + $0x194] sm:$0xf0] }
  0x65   :  { %1594 = vmatpush.bf16.msra.mxu2 %v2680_v22  ;;  %1608 = vmatpush.bf16.msra.mxu3 %v2808_v27  ;;  %v3128_v12 = vor.u32 %v3492_v63, %v3125_v2  ;;  %v2981_v15 = vld [vmem:[#allocation5 + $0x5d0] sm:$0xf0]  ;;  %v3488_v16 = vld [vmem:[#allocation5 + $0x6c4] sm:$0xf]  ;;  %v3331_v22 = vld [vmem:[#allocation5 + $0x1d4] sm:$0xf0]  ;;  %v2444_v58 = vor.u32 %v3323_v50, %v2443_v49 }
  0x66   :  { %1567 = vmatpush.bf16.msra.mxu0 %v2408_v33  ;;  %v3109_v18 = vld [vmem:[#allocation5 + $0x6d0] sm:$0xf0]  ;;  %v2984_v24 = vor.u32 %v3456_v14, %v2981_v15  ;;  %v3452_v27 = vld [vmem:[#allocation5 + $0x5a4] sm:$0xf]  ;;  %v2476_v30 = vor.u32 %v3331_v22, %v2475_v21  ;;  %v3295_v33 = vld [vmem:[#allocation5 + $0xb4] sm:$0xf0] }
  0x67   :  { %1581 = vmatpush.bf16.msra.mxu1 %v2536_v34  ;;  %v3112_v25 = vor.u32 %v3488_v16, %v3109_v18  ;;  %v2965_v28 = vld [vmem:[#allocation5 + $0x5b0] sm:$0xf0]  ;;  %v3484_v29 = vld [vmem:[#allocation5 + $0x6a4] sm:$0xf]  ;;  %v2459_v34 = vld [vmem:[#allocation5 + $0x1a8] sm:$0xf]  ;;  %v2332_v39 = vor.u32 %v3295_v33, %v2331_v32 }
  0x68   :  { %v3093_v31 = vld [vmem:[#allocation5 + $0x6b0] sm:$0xf0]  ;;  %v2968_v36 = vor.u32 %v3452_v27, %v2965_v28  ;;  %v3480_v44 = vld [vmem:[#allocation5 + $0x684] sm:$0xf]  ;;  %v2299_v60 = vld [vmem:[#allocation5 + $0x68] sm:$0xf] }
  0x69   :  { %1595 = vmatpush.bf16.msra.mxu2 %v2664_v35  ;;  %1609 = vmatpush.bf16.msra.mxu3 %v2792_v40  ;;  %v3327_v35 = vld [vmem:[#allocation5 + $0x1b4] sm:$0xf0]  ;;  %v3096_v38 = vor.u32 %v3484_v29, %v3093_v31  ;;  %v3448_v40 = vld [vmem:[#allocation5 + $0x584] sm:$0xf]  ;;  %v2949_v43 = vld [vmem:[#allocation5 + $0x590] sm:$0xf0] }
  0x6a   :  { %1568 = vmatpush.bf16.msra.mxu0 %v2392_v48  ;;  %v2460_v45 = vor.u32 %v3327_v35, %v2459_v34  ;;  %v3077_v46 = vld [vmem:[#allocation5 + $0x690] sm:$0xf0]  ;;  %v3291_v48 = vld [vmem:[#allocation5 + $0x94] sm:$0xf0]  ;;  %v3444_v54 = vld [vmem:[#allocation5 + $0x564] sm:$0xf] }
  0x6b   :  { %1582 = vmatpush.bf16.msra.mxu1 %v2520_v51  ;;  %v2952_v51 = vor.u32 %v3448_v40, %v2949_v43  ;;  %v2316_v53 = vor.u32 %v3291_v48, %v2315_v47  ;;  %v2933_v55 = vld [vmem:[#allocation5 + $0x570] sm:$0xf0]  ;;  %v3287_v61 = vld [vmem:[#allocation5 + $0x74] sm:$0xf0]  ;;  %v2427_v62 = vld [vmem:[#allocation5 + $0x168] sm:$0xf] }
  0x6c   :  { %v3061_v59 = vld [vmem:[#allocation5 + $0x670] sm:$0xf0]  ;;  %v3319_v63 = vld [vmem:[#allocation5 + $0x174] sm:$0xf0]  ;;  %v2300_v3 = vor.u32 %v3287_v61, %v2299_v60  ;;  %v3440_v4 = vld [vmem:[#allocation5 + $0x544] sm:$0xf] }
  0x6d   :  { %1596 = vmatpush.bf16.msra.mxu2 %v2648_v52  ;;  %1610 = vmatpush.bf16.msra.mxu3 %v2776_v56  ;;  %v3080_v52 = vor.u32 %v3480_v44, %v3077_v46  ;;  %v3476_v56 = vld [vmem:[#allocation5 + $0x664] sm:$0xf]  ;;  %v2428_v7 = vor.u32 %v3319_v63, %v2427_v62  ;;  %v3045_v8 = vld [vmem:[#allocation5 + $0x650] sm:$0xf0]  ;;  %v2267_v22 = vld [vmem:[#allocation5 + $0x28] sm:$0xf] }
  0x6e   :  { %1569 = vmatpush.bf16.msra.mxu0 %v2376_v1  ;;  %v2936_v1 = vor.u32 %v3444_v54, %v2933_v55  ;;  %v3064_v2 = vor.u32 %v3476_v56, %v3061_v59  ;;  %v2901_v18 = vld [vmem:[#allocation5 + $0x530] sm:$0xf0]  ;;  %v3468_v19 = vld [vmem:[#allocation5 + $0x624] sm:$0xf]  ;;  %v2251_v34 = vld [vmem:[#allocation5 + $0x8] sm:$0xf] }
  0x6f   :  { %1583 = vmatpush.bf16.msra.mxu1 %v2504_v5  ;;  %v2917_v5 = vld [vmem:[#allocation5 + $0x550] sm:$0xf0]  ;;  %v3432_v28 = vld [vmem:[#allocation5 + $0x504] sm:$0xf]  ;;  %v2619_v40 = vld [vmem:[#allocation5 + $0x2e8] sm:$0xf] }
  0x70   :  { %v2920_v14 = vor.u32 %v3440_v4, %v2917_v5  ;;  %v3029_v21 = vld [vmem:[#allocation5 + $0x630] sm:$0xf0]  ;;  %v3464_v32 = vld [vmem:[#allocation5 + $0x604] sm:$0xf]  ;;  %v3367_v43 = vld [vmem:[#allocation5 + $0x2f4] sm:$0xf0] }
  0x71   :  { %1597 = vmatpush.bf16.msra.mxu2 %v2632_v6  ;;  %1611 = vmatpush.bf16.msra.mxu3 %v2760_v9  ;;  %v3472_v6 = vld [vmem:[#allocation5 + $0x644] sm:$0xf]  ;;  %v2283_v9 = vld [vmem:[#allocation5 + $0x48] sm:$0xf]  ;;  %v2885_v29 = vld [vmem:[#allocation5 + $0x510] sm:$0xf0]  ;;  %v2620_v54 = vor.u32 %v3367_v43, %v2619_v40 }
  0x72   :  { %1618 = vmatpush.bf16.msrb.mxu0 %v3000_v10  ;;  %1584 = vmatmul.bf16.vlgmr.msra.gmra.mxu1 %v3693_v0  ;;  %v3283_v10 = vld [vmem:[#allocation5 + $0x54] sm:$0xf0]  ;;  %v3048_v15 = vor.u32 %v3472_v6, %v3045_v8  ;;  %v3013_v33 = vld [vmem:[#allocation5 + $0x610] sm:$0xf0]  ;;  %v2747_v44 = vld [vmem:[#allocation5 + $0x3e8] sm:$0xf] }
  0x73   :  { %1632 = vmatpush.bf16.msrb.mxu1 %v3128_v12  ;;  %1570 = vmatmul.bf16.vlgmr.msra.gmra.mxu0 %v3697_v11  ;;  %v2411_v12 = vld [vmem:[#allocation5 + $0x148] sm:$0xf]  ;;  %v2284_v16 = vor.u32 %v3283_v10, %v2283_v9  ;;  %v3399_v46 = vld [vmem:[#allocation5 + $0x3f4] sm:$0xf0]  ;;  %v3016_v49 = vor.u32 %v3464_v32, %v3013_v33 }
  0x74   :  { %1598 = vmatmul.bf16.vlgmr.msra.gmra.mxu2 %v3700_v23  ;;  %1612 = vmatmul.bf16.vlgmr.msra.gmra.mxu3 %v3703_v37  ;;  %v2875_v47 = vld [vmem:[#allocation5 + $0x4e8] sm:$0xf]  ;;  %v3431_v48 = vld [vmem:[#allocation5 + $0x4f4] sm:$0xf0]  ;;  %v2748_v55 = vor.u32 %v3399_v46, %v2747_v44 }
  0x75   :  { %1646 = vmatpush.bf16.msrb.mxu2 %v2364_v13  ;;  %1660 = vmatpush.bf16.msrb.mxu3 %v2492_v17  ;;  %v3315_v13 = vld [vmem:[#allocation5 + $0x154] sm:$0xf0]  ;;  %v3436_v17 = vld [vmem:[#allocation5 + $0x524] sm:$0xf]  ;;  %v2876_v56 = vor.u32 %v3431_v48, %v2875_v47  ;;  %v2731_v60 = vld [vmem:[#allocation5 + $0x3c8] sm:$0xf] }
  0x76   :  { %1619 = vmatpush.bf16.msrb.mxu0 %v2984_v24  ;;  %v2412_v20 = vor.u32 %v3315_v13, %v2411_v12  ;;  %v3279_v24 = vld [vmem:[#allocation5 + $0x34] sm:$0xf0]  ;;  %v2904_v27 = vor.u32 %v3436_v17, %v2901_v18  ;;  %v2859_v63 = vld [vmem:[#allocation5 + $0x4c8] sm:$0xf] }
  0x77   :  { %1633 = vmatpush.bf16.msrb.mxu1 %v3112_v25  ;;  %v2395_v25 = vld [vmem:[#allocation5 + $0x128] sm:$0xf]  ;;  %v2268_v31 = vor.u32 %v3279_v24, %v2267_v22  ;;  %v3363_v59 = vld [vmem:[#allocation5 + $0x2d4] sm:$0xf0] }
  0x78   :  { %v3395_v62 = vld [vmem:[#allocation5 + $0x3d4] sm:$0xf0]  ;;  %v2715_v9 = vld [vmem:[#allocation5 + $0x3a8] sm:$0xf] }
  0x79   :  { %1647 = vmatpush.bf16.msrb.mxu2 %v2348_v26  ;;  %1661 = vmatpush.bf16.msrb.mxu3 %v2476_v30  ;;  %v3311_v26 = vld [vmem:[#allocation5 + $0x134] sm:$0xf0]  ;;  %v3032_v30 = vor.u32 %v3468_v19, %v3029_v21  ;;  %v2732_v5 = vor.u32 %v3395_v62, %v2731_v60  ;;  %v2843_v13 = vld [vmem:[#allocation5 + $0x4a8] sm:$0xf] }
  0x7a   :  { %1620 = vmatpush.bf16.msrb.mxu0 %v2968_v36  ;;  %v2396_v35 = vor.u32 %v3311_v26, %v2395_v25  ;;  %v3275_v36 = vld [vmem:[#allocation5 + $0x14] sm:$0xf0]  ;;  %v2699_v22 = vld [vmem:[#allocation5 + $0x388] sm:$0xf] }
  0x7b   :  { %1634 = vmatpush.bf16.msrb.mxu1 %v3096_v38  ;;  %v2379_v38 = vld [vmem:[#allocation5 + $0x108] sm:$0xf]  ;;  %v2252_v50 = vor.u32 %v3275_v36, %v2251_v34  ;;  %v3359_v8 = vld [vmem:[#allocation5 + $0x2b4] sm:$0xf0] }
  0x7c   :  { %v3391_v12 = vld [vmem:[#allocation5 + $0x3b4] sm:$0xf0]  ;;  %v2827_v26 = vld [vmem:[#allocation5 + $0x488] sm:$0xf] }
  0x7d   :  { %1648 = vmatpush.bf16.msrb.mxu2 %v2332_v39  ;;  %1662 = vmatpush.bf16.msrb.mxu3 %v2460_v45  ;;  %v3307_v39 = vld [vmem:[#allocation5 + $0x114] sm:$0xf0]  ;;  %v2888_v45 = vor.u32 %v3432_v28, %v2885_v29  ;;  %v2716_v18 = vor.u32 %v3391_v12, %v2715_v9  ;;  %v2955_v28 = vld [vmem:[#allocation5 + $0x588] sm:$0xf] }
  0x7e   :  { %1621 = vmatpush.bf16.msrb.mxu0 %v2952_v51  ;;  %v3003_v51 = vld [vmem:[#allocation5 + $0x5e8] sm:$0xf]  ;;  %v3355_v21 = vld [vmem:[#allocation5 + $0x294] sm:$0xf0] }
  0x7f   :  { %1635 = vmatpush.bf16.msrb.mxu1 %v3080_v52  ;;  %v3463_v52 = vld [vmem:[#allocation5 + $0x5f4] sm:$0xf0]  ;;  %v2555_v33 = vld [vmem:[#allocation5 + $0x268] sm:$0xf] }
  0x80   :  { %v3004_v61 = vor.u32 %v3463_v52, %v3003_v51  ;;  %v3387_v25 = vld [vmem:[#allocation5 + $0x394] sm:$0xf0]  ;;  %v2939_v43 = vld [vmem:[#allocation5 + $0x568] sm:$0xf] }
  0x81   :  { %1649 = vmatpush.bf16.msrb.mxu2 %v2316_v53  ;;  %1663 = vmatpush.bf16.msrb.mxu3 %v2444_v58  ;;  %v2380_v53 = vor.u32 %v3307_v39, %v2379_v38  ;;  %v2603_v58 = vld [vmem:[#allocation5 + $0x2c8] sm:$0xf]  ;;  %v3451_v29 = vld [vmem:[#allocation5 + $0x594] sm:$0xf0] }
  0x82   :  { %1622 = vmatpush.bf16.msrb.mxu0 %v2936_v1  ;;  %v3427_v1 = vld [vmem:[#allocation5 + $0x4d4] sm:$0xf0]  ;;  %v2604_v4 = vor.u32 %v3363_v59, %v2603_v58  ;;  %v2956_v36 = vor.u32 %v3451_v29, %v2955_v28  ;;  %v2811_v39 = vld [vmem:[#allocation5 + $0x468] sm:$0xf] }
  0x83   :  { %1636 = vmatpush.bf16.msrb.mxu1 %v3064_v2  ;;  %v2987_v2 = vld [vmem:[#allocation5 + $0x5c8] sm:$0xf]  ;;  %v2860_v6 = vor.u32 %v3427_v1, %v2859_v63  ;;  %v3351_v34 = vld [vmem:[#allocation5 + $0x274] sm:$0xf0] }
  0x84   :  { %v3383_v38 = vld [vmem:[#allocation5 + $0x374] sm:$0xf0]  ;;  %v2539_v48 = vld [vmem:[#allocation5 + $0x248] sm:$0xf] }
  0x85   :  { %1650 = vmatpush.bf16.msrb.mxu2 %v2300_v3  ;;  %1664 = vmatpush.bf16.msrb.mxu3 %v2428_v7  ;;  %v3459_v3 = vld [vmem:[#allocation5 + $0x5d4] sm:$0xf0]  ;;  %v2587_v7 = vld [vmem:[#allocation5 + $0x2a8] sm:$0xf] }
  0x86   :  { %1623 = vmatpush.bf16.msrb.mxu0 %v2920_v14  ;;  %v2988_v10 = vor.u32 %v3459_v3, %v2987_v2  ;;  %v3423_v14 = vld [vmem:[#allocation5 + $0x4b4] sm:$0xf0]  ;;  %v2588_v17 = vor.u32 %v3359_v8, %v2587_v7  ;;  %v2651_v63 = vld [vmem:[#allocation5 + $0x328] sm:$0xf] }
  0x87   :  { %1637 = vmatpush.bf16.msrb.mxu1 %v3048_v15  ;;  %v2971_v15 = vld [vmem:[#allocation5 + $0x5a8] sm:$0xf]  ;;  %v2844_v19 = vor.u32 %v3423_v14, %v2843_v13  ;;  %v3415_v40 = vld [vmem:[#allocation5 + $0x474] sm:$0xf0] }
  0x88   :  { %v3447_v44 = vld [vmem:[#allocation5 + $0x574] sm:$0xf0]  ;;  %v2812_v47 = vor.u32 %v3415_v40, %v2811_v39  ;;  %v2779_v3 = vld [vmem:[#allocation5 + $0x428] sm:$0xf]  ;;  %v3297_v39 = vld [vmem:[#allocation5 + $0xcc] sm:$0xf] }
  0x89   :  { %1651 = vmatpush.bf16.msrb.mxu2 %v2284_v16  ;;  %1665 = vmatpush.bf16.msrb.mxu3 %v2412_v20  ;;  %v3455_v16 = vld [vmem:[#allocation5 + $0x5b4] sm:$0xf0]  ;;  %v2571_v20 = vld [vmem:[#allocation5 + $0x288] sm:$0xf]  ;;  %v2940_v51 = vor.u32 %v3447_v44, %v2939_v43  ;;  %v2349_v43 = vld [vmem:[#allocation5 + $0xd8] sm:$0xf0] }
  0x8a   :  { %1624 = vmatpush.bf16.msrb.mxu0 %v2904_v27  ;;  %v2972_v24 = vor.u32 %v3455_v16, %v2971_v15  ;;  %v3419_v27 = vld [vmem:[#allocation5 + $0x494] sm:$0xf0]  ;;  %v2507_v8 = vld [vmem:[#allocation5 + $0x208] sm:$0xf]  ;;  %v3329_v44 = vld [vmem:[#allocation5 + $0x1cc] sm:$0xf] }
  0x8b   :  { %1638 = vmatpush.bf16.msrb.mxu1 %v3032_v30  ;;  %v2572_v30 = vor.u32 %v3355_v21, %v2571_v20  ;;  %v2828_v32 = vor.u32 %v3419_v27, %v2827_v26  ;;  %v3379_v52 = vld [vmem:[#allocation5 + $0x354] sm:$0xf0]  ;;  %v2635_v13 = vld [vmem:[#allocation5 + $0x308] sm:$0xf]  ;;  %v3333_v26 = vld [vmem:[#allocation5 + $0x1ec] sm:$0xf] }
  0x8c   :  { %v3343_v62 = vld [vmem:[#allocation5 + $0x234] sm:$0xf0]  ;;  %v2763_v15 = vld [vmem:[#allocation5 + $0x408] sm:$0xf]  ;;  %v2493_v27 = vld [vmem:[#allocation5 + $0x1f8] sm:$0xf0] }
  0x8d   :  { %1652 = vmatpush.bf16.msrb.mxu2 %v2268_v31  ;;  %1666 = vmatpush.bf16.msrb.mxu3 %v2396_v35  ;;  %v2700_v31 = vor.u32 %v3387_v25, %v2699_v22  ;;  %v2683_v35 = vld [vmem:[#allocation5 + $0x368] sm:$0xf]  ;;  %v3375_v2 = vld [vmem:[#allocation5 + $0x334] sm:$0xf0]  ;;  %v3301_v22 = vld [vmem:[#allocation5 + $0xec] sm:$0xf] }
  0x8e   :  { %1625 = vmatpush.bf16.msrb.mxu0 %v2888_v45  ;;  %v2556_v45 = vor.u32 %v3351_v34, %v2555_v33  ;;  %v2684_v46 = vor.u32 %v3383_v38, %v2683_v35  ;;  %v3339_v9 = vld [vmem:[#allocation5 + $0x214] sm:$0xf0]  ;;  %v3131_v20 = vld [vmem:[#allocation5 + $0x6e8] sm:$0xf]  ;;  %v2365_v25 = vld [vmem:[#allocation5 + $0xf8] sm:$0xf0]  ;;  %v2496_v35 = vor.u32 %v3333_v26, %v2493_v27 }
  0x8f   :  { %1639 = vmatpush.bf16.msrb.mxu1 %v3016_v49  ;;  %v3347_v49 = vld [vmem:[#allocation5 + $0x254] sm:$0xf0]  ;;  %v2368_v34 = vor.u32 %v3301_v22, %v2365_v25  ;;  %v2557_v22 = vld [vmem:[#allocation5 + $0x278] sm:$0xf0]  ;;  %v3051_v27 = vld [vmem:[#allocation5 + $0x648] sm:$0xf] }
  0x90   :  { %v2540_v58 = vor.u32 %v3347_v49, %v2539_v48  ;;  %v3371_v14 = vld [vmem:[#allocation5 + $0x314] sm:$0xf0]  ;;  %v2352_v49 = vor.u32 %v3297_v39, %v2349_v43 }
  0x91   :  { %1653 = vmatpush.bf16.msrb.mxu2 %v2252_v50  ;;  %1667 = vmatpush.bf16.msrb.mxu3 %v2380_v53  ;;  %v2667_v50 = vld [vmem:[#allocation5 + $0x348] sm:$0xf]  ;;  %v3495_v21 = vld [vmem:[#allocation5 + $0x6f4] sm:$0xf0]  ;;  %v2636_v28 = vor.u32 %v3371_v14, %v2635_v13 }
  0x92   :  { %1674 = vmatpush.bf16.msra.mxu0 %v2620_v54  ;;  %1640 = vmatmul.bf16.vlgmr.msrb.gmra.mxu1 %v3705_v41  ;;  %v2795_v53 = vld [vmem:[#allocation5 + $0x448] sm:$0xf]  ;;  %v3411_v54 = vld [vmem:[#allocation5 + $0x454] sm:$0xf0]  ;;  %v2668_v59 = vor.u32 %v3379_v52, %v2667_v50  ;;  %v3132_v33 = vor.u32 %v3495_v21, %v3131_v20  ;;  %v2429_v20 = vld [vmem:[#allocation5 + $0x178] sm:$0xf0] }
  0x93   :  { %1688 = vmatpush.bf16.msra.mxu1 %v2748_v55  ;;  %1626 = vmatmul.bf16.vlgmr.msrb.gmra.mxu0 %v3707_v42  ;;  %v2923_v55 = vld [vmem:[#allocation5 + $0x548] sm:$0xf]  ;;  %v2796_v60 = vor.u32 %v3411_v54, %v2795_v53  ;;  %v3491_v38 = vld [vmem:[#allocation5 + $0x6d4] sm:$0xf0]  ;;  %v3293_v53 = vld [vmem:[#allocation5 + $0xac] sm:$0xf] }
  0x94   :  { %1654 = vmatmul.bf16.vlgmr.msrb.gmra.mxu2 %v3691_v57  ;;  %1668 = vmatmul.bf16.vlgmr.msrb.gmra.mxu3 %v3697_v11  ;;  %v3487_v52 = vld [vmem:[#allocation5 + $0x6b4] sm:$0xf0]  ;;  %v3067_v14 = vld [vmem:[#allocation5 + $0x668] sm:$0xf]  ;;  %v3349_v21 = vld [vmem:[#allocation5 + $0x26c] sm:$0xf] }
  0x95   :  { %1702 = vmatpush.bf16.msra.mxu2 %v2876_v56  ;;  %1716 = vmatpush.bf16.msra.mxu3 %v3004_v61  ;;  %v3443_v56 = vld [vmem:[#allocation5 + $0x554] sm:$0xf0]  ;;  %v2523_v61 = vld [vmem:[#allocation5 + $0x228] sm:$0xf] }
  0x96   :  { %1675 = vmatpush.bf16.msra.mxu0 %v2604_v4  ;;  %v2924_v1 = vor.u32 %v3443_v56, %v2923_v55  ;;  %v3407_v4 = vld [vmem:[#allocation5 + $0x434] sm:$0xf0]  ;;  %v2524_v7 = vor.u32 %v3343_v62, %v2523_v61  ;;  %v2333_v55 = vld [vmem:[#allocation5 + $0xb8] sm:$0xf0]  ;;  %v3325_v56 = vld [vmem:[#allocation5 + $0x1ac] sm:$0xf] }
  0x97   :  { %1689 = vmatpush.bf16.msra.mxu1 %v2732_v5  ;;  %v2907_v5 = vld [vmem:[#allocation5 + $0x528] sm:$0xf]  ;;  %v2780_v12 = vor.u32 %v3407_v4, %v2779_v3  ;;  %v2336_v62 = vor.u32 %v3293_v53, %v2333_v55  ;;  %v3289_v3 = vld [vmem:[#allocation5 + $0x8c] sm:$0xf]  ;;  %v3471_v43 = vld [vmem:[#allocation5 + $0x634] sm:$0xf0] }
  0x98   :  { %v3467_v53 = vld [vmem:[#allocation5 + $0x614] sm:$0xf0] }
  0x99   :  { %1703 = vmatpush.bf16.msra.mxu2 %v2860_v6  ;;  %1717 = vmatpush.bf16.msra.mxu3 %v2988_v10  ;;  %v3439_v6 = vld [vmem:[#allocation5 + $0x534] sm:$0xf0]  ;;  %v2652_v10 = vor.u32 %v3375_v2, %v2651_v63 }
  0x9a   :  { %1676 = vmatpush.bf16.msra.mxu0 %v2588_v17  ;;  %v2908_v16 = vor.u32 %v3439_v6, %v2907_v5  ;;  %v3403_v17 = vld [vmem:[#allocation5 + $0x414] sm:$0xf0]  ;;  %v2317_v5 = vld [vmem:[#allocation5 + $0x98] sm:$0xf0]  ;;  %v3321_v6 = vld [vmem:[#allocation5 + $0x18c] sm:$0xf] }
  0x9b   :  { %1690 = vmatpush.bf16.msra.mxu1 %v2716_v18  ;;  %v2891_v18 = vld [vmem:[#allocation5 + $0x508] sm:$0xf]  ;;  %v2764_v29 = vor.u32 %v3403_v17, %v2763_v15  ;;  %v3483_v2 = vld [vmem:[#allocation5 + $0x694] sm:$0xf0] }
  0x9c   :  { %v3479_v15 = vld [vmem:[#allocation5 + $0x674] sm:$0xf0] }
  0x9d   :  { %1704 = vmatpush.bf16.msra.mxu2 %v2844_v19  ;;  %1718 = vmatpush.bf16.msra.mxu3 %v2972_v24  ;;  %v3435_v19 = vld [vmem:[#allocation5 + $0x514] sm:$0xf0]  ;;  %v2508_v24 = vor.u32 %v3339_v9, %v2507_v8  ;;  %v3353_v8 = vld [vmem:[#allocation5 + $0x28c] sm:$0xf]  ;;  %v2573_v9 = vld [vmem:[#allocation5 + $0x298] sm:$0xf0] }
  0x9e   :  { %1677 = vmatpush.bf16.msra.mxu0 %v2572_v30  ;;  %v3365_v30 = vld [vmem:[#allocation5 + $0x2ec] sm:$0xf]  ;;  %v2576_v17 = vor.u32 %v3353_v8, %v2573_v9 }
  0x9f   :  { %1691 = vmatpush.bf16.msra.mxu1 %v2700_v31  ;;  %v2621_v31 = vld [vmem:[#allocation5 + $0x2f8] sm:$0xf0] }
  0xa0   :  { %v2624_v40 = vor.u32 %v3365_v30, %v2621_v31  ;;  %v2560_v30 = vor.u32 %v3349_v21, %v2557_v22  ;;  %v2285_v31 = vld [vmem:[#allocation5 + $0x58] sm:$0xf0]  ;;  %v3457_v22 = vld [vmem:[#allocation5 + $0x5cc] sm:$0xf] }
  0xa1   :  { %1705 = vmatpush.bf16.msra.mxu2 %v2828_v32  ;;  %1719 = vmatpush.bf16.msra.mxu3 %v2956_v36  ;;  %v2892_v32 = vor.u32 %v3435_v19, %v2891_v18  ;;  %v3115_v36 = vld [vmem:[#allocation5 + $0x6c8] sm:$0xf]  ;;  %v2301_v18 = vld [vmem:[#allocation5 + $0x78] sm:$0xf0]  ;;  %v3317_v19 = vld [vmem:[#allocation5 + $0x16c] sm:$0xf] }
  0xa2   :  { %1678 = vmatpush.bf16.msra.mxu0 %v2556_v45  ;;  %v2477_v45 = vld [vmem:[#allocation5 + $0x1d8] sm:$0xf0]  ;;  %v3116_v48 = vor.u32 %v3491_v38, %v3115_v36  ;;  %v2432_v26 = vor.u32 %v3317_v19, %v2429_v20  ;;  %v3425_v19 = vld [vmem:[#allocation5 + $0x4cc] sm:$0xf] }
  0xa3   :  { %1692 = vmatpush.bf16.msra.mxu1 %v2684_v46  ;;  %v3361_v46 = vld [vmem:[#allocation5 + $0x2cc] sm:$0xf]  ;;  %v2480_v50 = vor.u32 %v3329_v44, %v2477_v45  ;;  %v2861_v21 = vld [vmem:[#allocation5 + $0x4d8] sm:$0xf0] }
  0xa4   :  { %v3277_v44 = vld [vmem:[#allocation5 + $0x2c] sm:$0xf] }
  0xa5   :  { %1706 = vmatpush.bf16.msra.mxu2 %v2812_v47  ;;  %1720 = vmatpush.bf16.msra.mxu3 %v2940_v51  ;;  %v2605_v47 = vld [vmem:[#allocation5 + $0x2d8] sm:$0xf0]  ;;  %v3099_v51 = vld [vmem:[#allocation5 + $0x6a8] sm:$0xf] }
  0xa6   :  { %1679 = vmatpush.bf16.msra.mxu0 %v2540_v58  ;;  %v2608_v54 = vor.u32 %v3361_v46, %v2605_v47  ;;  %v2461_v58 = vld [vmem:[#allocation5 + $0x1b8] sm:$0xf0]  ;;  %v3100_v61 = vor.u32 %v3487_v52, %v3099_v51  ;;  %v3309_v47 = vld [vmem:[#allocation5 + $0x12c] sm:$0xf]  ;;  %v3019_v52 = vld [vmem:[#allocation5 + $0x608] sm:$0xf] }
  0xa7   :  { %1693 = vmatpush.bf16.msra.mxu1 %v2668_v59  ;;  %v3357_v59 = vld [vmem:[#allocation5 + $0x2ac] sm:$0xf]  ;;  %v2464_v63 = vor.u32 %v3325_v56, %v2461_v58  ;;  %v2269_v46 = vld [vmem:[#allocation5 + $0x38] sm:$0xf0] }
  0xa8   :  { %v3273_v56 = vld [vmem:[#allocation5 + $0xc] sm:$0xf]  ;;  %v2253_v58 = vld [vmem:[#allocation5 + $0x18] sm:$0xf0] }
  0xa9   :  { %1707 = vmatpush.bf16.msra.mxu2 %v2796_v60  ;;  %1721 = vmatpush.bf16.msra.mxu3 %v2924_v1  ;;  %v2589_v60 = vld [vmem:[#allocation5 + $0x2b8] sm:$0xf0]  ;;  %v3083_v1 = vld [vmem:[#allocation5 + $0x688] sm:$0xf]  ;;  %v2256_v8 = vor.u32 %v3273_v56, %v2253_v58  ;;  %v3413_v56 = vld [vmem:[#allocation5 + $0x46c] sm:$0xf] }
  0xaa   :  { %1680 = vmatpush.bf16.msra.mxu0 %v2524_v7  ;;  %v2592_v4 = vor.u32 %v3357_v59, %v2589_v60  ;;  %v2445_v7 = vld [vmem:[#allocation5 + $0x198] sm:$0xf0]  ;;  %v3305_v59 = vld [vmem:[#allocation5 + $0x10c] sm:$0xf] }
  0xab   :  { %1694 = vmatpush.bf16.msra.mxu1 %v2652_v10  ;;  %v3084_v10 = vor.u32 %v3483_v2, %v3083_v1  ;;  %v2448_v13 = vor.u32 %v3321_v6, %v2445_v7  ;;  %v3397_v1 = vld [vmem:[#allocation5 + $0x3ec] sm:$0xf]  ;;  %v2749_v2 = vld [vmem:[#allocation5 + $0x3f8] sm:$0xf0] }
  0xac   :  { %v3461_v6 = vld [vmem:[#allocation5 + $0x5ec] sm:$0xf]  ;;  %v3005_v7 = vld [vmem:[#allocation5 + $0x5f8] sm:$0xf0] }
  0xad   :  { %1708 = vmatpush.bf16.msra.mxu2 %v2780_v12  ;;  %1722 = vmatpush.bf16.msra.mxu3 %v2908_v16  ;;  %v2320_v12 = vor.u32 %v3289_v3, %v2317_v5  ;;  %v3285_v16 = vld [vmem:[#allocation5 + $0x6c] sm:$0xf]  ;;  %v2877_v5 = vld [vmem:[#allocation5 + $0x4f8] sm:$0xf0] }
  0xae   :  { %1681 = vmatpush.bf16.msra.mxu0 %v2508_v24  ;;  %v3068_v24 = vor.u32 %v3479_v15, %v3067_v14  ;;  %v2304_v25 = vor.u32 %v3285_v16, %v2301_v18  ;;  %v3429_v3 = vld [vmem:[#allocation5 + $0x4ec] sm:$0xf]  ;;  %v2752_v14 = vor.u32 %v3397_v1, %v2749_v2  ;;  %v3008_v16 = vor.u32 %v3461_v6, %v3005_v7  ;;  %v2733_v18 = vld [vmem:[#allocation5 + $0x3d8] sm:$0xf0] }
  0xaf   :  { %1695 = vmatpush.bf16.msra.mxu1 %v2636_v28  ;;  %v3475_v28 = vld [vmem:[#allocation5 + $0x654] sm:$0xf0]  ;;  %v2880_v15 = vor.u32 %v3429_v3, %v2877_v5  ;;  %v3069_v1 = vld [vmem:[#allocation5 + $0x678] sm:$0xf0]  ;;  %v3731_v2 = vpop.f32.mrf.mxu1  ;;  %v3377_v6 = vld [vmem:[#allocation5 + $0x34c] sm:$0xf] }
  0xb0   :  { %v3052_v36 = vor.u32 %v3475_v28, %v3051_v27  ;;  %v2864_v28 = vor.u32 %v3425_v19, %v2861_v21  ;;  %v2669_v7 = vld [vmem:[#allocation5 + $0x358] sm:$0xf0]  ;;  %v3373_v19 = vld [vmem:[#allocation5 + $0x32c] sm:$0xf] }
  0xb1   :  { %1709 = vmatpush.bf16.msra.mxu2 %v2764_v29  ;;  %1723 = vmatpush.bf16.msra.mxu3 %v2892_v32  ;;  %v3281_v29 = vld [vmem:[#allocation5 + $0x4c] sm:$0xf] }
  0xb2   :  { %1730 = vmatpush.bf16.msrb.mxu0 %v3132_v33  ;;  %1696 = vmatmul.bf16.vlgmr.msra.gmra.mxu1 %v3700_v23  ;;  %v3313_v32 = vld [vmem:[#allocation5 + $0x14c] sm:$0xf]  ;;  %v2413_v33 = vld [vmem:[#allocation5 + $0x158] sm:$0xf0]  ;;  %v2288_v38 = vor.u32 %v3281_v29, %v2285_v31 }
  0xb3   :  { %1744 = vmatpush.bf16.msrb.mxu1 %v2368_v34  ;;  %1682 = vmatmul.bf16.vlgmr.msra.gmra.mxu0 %v3693_v0  ;;  %v3345_v34 = vld [vmem:[#allocation5 + $0x24c] sm:$0xf]  ;;  %v2416_v39 = vor.u32 %v3313_v32, %v2413_v33  ;;  %v2717_v31 = vld [vmem:[#allocation5 + $0x3b8] sm:$0xf0] }
  0xb4   :  { %1710 = vmatmul.bf16.vlgmr.msra.gmra.mxu2 %v3703_v37  ;;  %1724 = vmatmul.bf16.vlgmr.msra.gmra.mxu3 %v3707_v42  ;;  %v3421_v32 = vld [vmem:[#allocation5 + $0x4ac] sm:$0xf] }
  0xb5   :  { %1758 = vmatpush.bf16.msrb.mxu2 %v2496_v35  ;;  %1772 = vmatpush.bf16.msrb.mxu3 %v2624_v40  ;;  %v2541_v35 = vld [vmem:[#allocation5 + $0x258] sm:$0xf0]  ;;  %v3035_v40 = vld [vmem:[#allocation5 + $0x628] sm:$0xf]  ;;  %v3405_v21 = vld [vmem:[#allocation5 + $0x42c] sm:$0xf] }
  0xb6   :  { %1731 = vmatpush.bf16.msrb.mxu0 %v3116_v48  ;;  %v2544_v45 = vor.u32 %v3345_v34, %v2541_v35  ;;  %v2397_v48 = vld [vmem:[#allocation5 + $0x138] sm:$0xf0]  ;;  %v3036_v51 = vor.u32 %v3471_v43, %v3035_v40  ;;  %v3453_v35 = vld [vmem:[#allocation5 + $0x5ac] sm:$0xf] }
  0xb7   :  { %1745 = vmatpush.bf16.msrb.mxu1 %v2352_v49  ;;  %v3341_v49 = vld [vmem:[#allocation5 + $0x22c] sm:$0xf]  ;;  %v2400_v55 = vor.u32 %v3309_v47, %v2397_v48  ;;  %v2845_v34 = vld [vmem:[#allocation5 + $0x4b8] sm:$0xf0] }
  0xb8   :  { %v2848_v43 = vor.u32 %v3421_v32, %v2845_v34  ;;  %v3417_v47 = vld [vmem:[#allocation5 + $0x48c] sm:$0xf] }
  0xb9   :  { %1759 = vmatpush.bf16.msrb.mxu2 %v2480_v50  ;;  %1773 = vmatpush.bf16.msrb.mxu3 %v2608_v54  ;;  %v2525_v50 = vld [vmem:[#allocation5 + $0x238] sm:$0xf0]  ;;  %v2272_v54 = vor.u32 %v3277_v44, %v2269_v46  ;;  %v3369_v34 = vld [vmem:[#allocation5 + $0x30c] sm:$0xf] }
  0xba   :  { %1732 = vmatpush.bf16.msrb.mxu0 %v3100_v61  ;;  %v2528_v60 = vor.u32 %v3341_v49, %v2525_v50  ;;  %v2381_v61 = vld [vmem:[#allocation5 + $0x118] sm:$0xf0]  ;;  %v3449_v50 = vld [vmem:[#allocation5 + $0x58c] sm:$0xf] }
  0xbb   :  { %1746 = vmatpush.bf16.msrb.mxu1 %v2336_v62  ;;  %v3337_v62 = vld [vmem:[#allocation5 + $0x20c] sm:$0xf]  ;;  %v2384_v9 = vor.u32 %v3305_v59, %v2381_v61  ;;  %v2701_v46 = vld [vmem:[#allocation5 + $0x398] sm:$0xf0] }
  0xbc   :  { %v2829_v49 = vld [vmem:[#allocation5 + $0x498] sm:$0xf0] }
  0xbd   :  { %1760 = vmatpush.bf16.msrb.mxu2 %v2464_v63  ;;  %1774 = vmatpush.bf16.msrb.mxu3 %v2592_v4  ;;  %v2509_v63 = vld [vmem:[#allocation5 + $0x218] sm:$0xf0]  ;;  %v3020_v4 = vor.u32 %v3467_v53, %v3019_v52  ;;  %v2832_v53 = vor.u32 %v3417_v47, %v2829_v49 }
  0xbe   :  { %1733 = vmatpush.bf16.msrb.mxu0 %v3084_v10  ;;  %v3493_v10 = vld [vmem:[#allocation5 + $0x6ec] sm:$0xf]  ;;  %v2813_v59 = vld [vmem:[#allocation5 + $0x478] sm:$0xf0] }
  0xbf   :  { %1747 = vmatpush.bf16.msrb.mxu1 %v2320_v12  ;;  %v3133_v12 = vld [vmem:[#allocation5 + $0x6f8] sm:$0xf0] }
  0xc0   :  { %v3136_v20 = vor.u32 %v3493_v10, %v3133_v12  ;;  %v2941_v61 = vld [vmem:[#allocation5 + $0x578] sm:$0xf0]  ;;  %v3441_v12 = vld [vmem:[#allocation5 + $0x54c] sm:$0xf] }
  0xc1   :  { %1761 = vmatpush.bf16.msrb.mxu2 %v2448_v13  ;;  %1775 = vmatpush.bf16.msrb.mxu3 %v2576_v17  ;;  %v2512_v13 = vor.u32 %v3337_v62, %v2509_v63  ;;  %v3393_v17 = vld [vmem:[#allocation5 + $0x3cc] sm:$0xf]  ;;  %v3729_v62 = vpop.f32.mrf.mxu0  ;;  %v2797_v10 = vld [vmem:[#allocation5 + $0x458] sm:$0xf0] }
  0xc2   :  { %1734 = vmatpush.bf16.msrb.mxu0 %v3068_v24  ;;  %v2989_v24 = vld [vmem:[#allocation5 + $0x5d8] sm:$0xf0]  ;;  %v2736_v27 = vor.u32 %v3393_v17, %v2733_v18  ;;  %v3477_v63 = vld [vmem:[#allocation5 + $0x66c] sm:$0xf] }
  0xc3   :  { %1748 = vmatpush.bf16.msrb.mxu1 %v2304_v25  ;;  %v3489_v25 = vld [vmem:[#allocation5 + $0x6cc] sm:$0xf]  ;;  %v2992_v29 = vor.u32 %v3457_v22, %v2989_v24  ;;  %v1487_v22 = vpop.f32.mrf.mxu2  ;;  %v3021_v47 = vld [vmem:[#allocation5 + $0x618] sm:$0xf0] }
  0xc5   :  { %1762 = vmatpush.bf16.msrb.mxu2 %v2432_v26  ;;  %1776 = vmatpush.bf16.msrb.mxu3 %v2560_v30  ;;  %v3117_v26 = vld [vmem:[#allocation5 + $0x6d8] sm:$0xf0]  ;;  %v3389_v30 = vld [vmem:[#allocation5 + $0x3ac] sm:$0xf] }
  0xc6   :  { %1735 = vmatpush.bf16.msrb.mxu0 %v3052_v36  ;;  %v3120_v33 = vor.u32 %v3489_v25, %v3117_v26  ;;  %v2973_v36 = vld [vmem:[#allocation5 + $0x5b8] sm:$0xf0]  ;;  %v2720_v40 = vor.u32 %v3389_v30, %v2717_v31  ;;  %v3437_v26 = vld [vmem:[#allocation5 + $0x52c] sm:$0xf] }
  0xc7   :  { %1749 = vmatpush.bf16.msrb.mxu1 %v2288_v38  ;;  %v3485_v38 = vld [vmem:[#allocation5 + $0x6ac] sm:$0xf]  ;;  %v2976_v44 = vor.u32 %v3453_v35, %v2973_v36  ;;  %v2781_v25 = vld [vmem:[#allocation5 + $0x438] sm:$0xf0] }
  0xc8   :  { %v2784_v32 = vor.u32 %v3405_v21, %v2781_v25  ;;  %v2637_v35 = vld [vmem:[#allocation5 + $0x318] sm:$0xf0]  ;;  %v3401_v36 = vld [vmem:[#allocation5 + $0x40c] sm:$0xf]  ;;  %v3504_v25 = vld [vmem:[#allocation7 + $0x40] sm:$0xff] }
  0xc9   :  { %1763 = vmatpush.bf16.msrb.mxu2 %v2416_v39  ;;  %1777 = vmatpush.bf16.msrb.mxu3 %v2544_v45  ;;  %v3101_v39 = vld [vmem:[#allocation5 + $0x6b8] sm:$0xf0]  ;;  %v3385_v45 = vld [vmem:[#allocation5 + $0x38c] sm:$0xf]  ;;  %v1461_v31 = vpop.f32.mrf.mxu0 }
  0xca   :  { %1736 = vmatpush.bf16.msrb.mxu0 %v3036_v51  ;;  %v3104_v48 = vor.u32 %v3485_v38, %v3101_v39  ;;  %v3481_v51 = vld [vmem:[#allocation5 + $0x68c] sm:$0xf]  ;;  %v2704_v52 = vor.u32 %v3385_v45, %v2701_v46  ;;  %v1475_v38 = vpop.f32.mrf.mxu1  ;;  %v1501_v45 = vpop.f32.mrf.mxu3 }
  0xcb   :  { %1750 = vmatpush.bf16.msrb.mxu1 %v2272_v54  ;;  %v3381_v54 = vld [vmem:[#allocation5 + $0x36c] sm:$0xf] }
  0xcc   :  { %v3465_v46 = vld [vmem:[#allocation5 + $0x60c] sm:$0xf] }
  0xcd   :  { %1764 = vmatpush.bf16.msrb.mxu2 %v2400_v55  ;;  %1778 = vmatpush.bf16.msrb.mxu3 %v2528_v60  ;;  %v2685_v55 = vld [vmem:[#allocation5 + $0x378] sm:$0xf0]  ;;  %v3445_v60 = vld [vmem:[#allocation5 + $0x56c] sm:$0xf] }
  0xce   :  { %1737 = vmatpush.bf16.msrb.mxu0 %v3020_v4  ;;  %v2688_v3 = vor.u32 %v3381_v54, %v2685_v55  ;;  %v2816_v4 = vor.u32 %v3413_v56, %v2813_v59  ;;  %v2944_v5 = vor.u32 %v3445_v60, %v2941_v61  ;;  %v3510_v54 = vld [vmem:[#allocation7 + $0x70] sm:$0xff]  ;;  %v1474_v56 = vadd.f32 %v3731_v2, %v3729_v62  ;;  %v3501_v59 = vld [vmem:[#allocation7 + $0x28] sm:$0xff]  ;;  %v3499_v62 = vld [vmem:[#allocation7 + $0x18] sm:$0xff] }
  0xcf   :  { %1751 = vmatpush.bf16.msrb.mxu1 %v2256_v8  ;;  %v3409_v8 = vld [vmem:[#allocation5 + $0x44c] sm:$0xf]  ;;  %v1476_v60 = vadd.f32 %v1475_v38, %v1461_v31 }
  0xd0   :  { %v2800_v17 = vor.u32 %v3409_v8, %v2797_v10  ;;  %v3509_v61 = vld [vmem:[#allocation7 + $0x68] sm:$0xff]  ;;  %v3506_v10 = vld [vmem:[#allocation7 + $0x50] sm:$0xff] }
  0xd1   :  { %1765 = vmatpush.bf16.msrb.mxu2 %v2384_v9  ;;  %1779 = vmatpush.bf16.msrb.mxu3 %v2512_v13  ;;  %v3072_v9 = vor.u32 %v3477_v63, %v3069_v1  ;;  %v2925_v13 = vld [vmem:[#allocation5 + $0x558] sm:$0xf0]  ;;  %v1488_v63 = vadd.f32 %v1487_v22, %v1474_v56  ;;  %v3500_v1 = vld [vmem:[#allocation7 + $0x20] sm:$0xff] }
  0xd2   :  { %1786 = vmatpush.bf16.msra.mxu0 %v2752_v14  ;;  %1752 = vmatmul.bf16.vlgmr.msrb.gmra.mxu1 %v3691_v57  ;;  %v3473_v14 = vld [vmem:[#allocation5 + $0x64c] sm:$0xf]  ;;  %v2928_v18 = vor.u32 %v3441_v12, %v2925_v13  ;;  %v1529_v55 = vpop.f32.mrf.mxu1  ;;  %v3496_v22 = vld [vmem:[#allocation7] sm:$0xff] }
  0xd3   :  { %1800 = vmatpush.bf16.msra.mxu1 %v2880_v15  ;;  %1738 = vmatmul.bf16.vlgmr.msrb.gmra.mxu0 %v3705_v41  ;;  %v3053_v15 = vld [vmem:[#allocation5 + $0x658] sm:$0xf0]  ;;  %v3516_v56 = vld [vmem:[#allocation7 + $0xa0] sm:$0xff] }
  0xd4   :  { %1766 = vmatmul.bf16.vlgmr.msrb.gmra.mxu2 %v3697_v11  ;;  %1780 = vmatmul.bf16.vlgmr.msrb.gmra.mxu3 %v3693_v0  ;;  %v2957_v11 = vld [vmem:[#allocation5 + $0x598] sm:$0xf0]  ;;  %v3056_v24 = vor.u32 %v3473_v14, %v3053_v15 }
  0xd5   :  { %1814 = vmatpush.bf16.msra.mxu2 %v3008_v16  ;;  %1828 = vmatpush.bf16.msra.mxu3 %v3136_v20  ;;  %v3085_v0 = vld [vmem:[#allocation5 + $0x698] sm:$0xf0]  ;;  %v2960_v57 = vor.u32 %v3449_v50, %v2957_v11  ;;  %v2672_v16 = vor.u32 %v3377_v6, %v2669_v7  ;;  %v3024_v11 = vor.u32 %v3465_v46, %v3021_v47 }
  0xd6   :  { %1787 = vmatpush.bf16.msra.mxu0 %v2736_v27  ;;  %v3088_v58 = vor.u32 %v3481_v51, %v3085_v0  ;;  %v2653_v20 = vld [vmem:[#allocation5 + $0x338] sm:$0xf0] }
  0xd7   :  { %1801 = vmatpush.bf16.msra.mxu1 %v2864_v28  ;;  %v2909_v27 = vld [vmem:[#allocation5 + $0x538] sm:$0xf0]  ;;  %v3469_v28 = vld [vmem:[#allocation5 + $0x62c] sm:$0xf]  ;;  %v2656_v30 = vor.u32 %v3373_v19, %v2653_v20 }
  0xd8   :  { %v3503_v51 = vld [vmem:[#allocation7 + $0x38] sm:$0xff]  ;;  %v3505_v20 = vld [vmem:[#allocation7 + $0x48] sm:$0xff] }
  0xd9   :  { %1815 = vmatpush.bf16.msra.mxu2 %v2992_v29  ;;  %1829 = vmatpush.bf16.msra.mxu3 %v3120_v33  ;;  %v3037_v29 = vld [vmem:[#allocation5 + $0x638] sm:$0xf0]  ;;  %v2912_v33 = vor.u32 %v3437_v26, %v2909_v27 }
  0xda   :  { %1788 = vmatpush.bf16.msra.mxu0 %v2720_v40  ;;  %v3040_v39 = vor.u32 %v3469_v28, %v3037_v29  ;;  %v2765_v40 = vld [vmem:[#allocation5 + $0x418] sm:$0xf0]  ;;  %v1531_v6 = vpop.f32.mrf.mxu1 }
  0xdb   :  { %1802 = vmatpush.bf16.msra.mxu1 %v2848_v43  ;;  %v3433_v43 = vld [vmem:[#allocation5 + $0x50c] sm:$0xf]  ;;  %v2768_v49 = vor.u32 %v3401_v36, %v2765_v40  ;;  %v3511_v0 = vld [vmem:[#allocation7 + $0x78] sm:$0xff] }
  0xdd   :  { %1816 = vmatpush.bf16.msra.mxu2 %v2976_v44  ;;  %1830 = vmatpush.bf16.msra.mxu3 %v3104_v48  ;;  %v2893_v44 = vld [vmem:[#allocation5 + $0x518] sm:$0xf0]  ;;  %v2640_v48 = vor.u32 %v3369_v34, %v2637_v35 }
  0xde   :  { %1789 = vmatpush.bf16.msra.mxu0 %v2704_v52  ;;  %v2896_v50 = vor.u32 %v3433_v43, %v2893_v44  ;;  %v1489_v52 = vpop.f32.mrf.mxu2 }
  0xdf   :  { %1803 = vmatpush.bf16.msra.mxu1 %v2832_v53  ;;  %v3502_v53 = vld [vmem:[#allocation7 + $0x30] sm:$0xff] }
  0xe1   :  { %1817 = vmatpush.bf16.msra.mxu2 %v2960_v57  ;;  %1831 = vmatpush.bf16.msra.mxu3 %v3088_v58  ;;  %v1515_v57 = vpop.f32.mrf.mxu0  ;;  %v1503_v58 = vpop.f32.mrf.mxu3 }
  0xe2   :  { %1790 = vmatpush.bf16.msra.mxu0 %v2688_v3  ;;  %v1490_v3 = vadd.f32 %v1489_v52, %v1476_v60  ;;  %v3514_v60 = vld [vmem:[#allocation7 + $0x90] sm:$0xff] }
  0xe3   :  { %1804 = vmatpush.bf16.msra.mxu1 %v2816_v4  ;;  %v1502_v4 = vadd.f32 %v1501_v45, %v1488_v63  ;;  %v3513_v63 = vld [vmem:[#allocation7 + $0x88] sm:$0xff] }
  0xe4   :  { %v1504_v2 = vadd.f32 %v1503_v58, %v1490_v3  ;;  %v3515_v58 = vld [vmem:[#allocation7 + $0x98] sm:$0xff] }
  0xe5   :  { %1818 = vmatpush.bf16.msra.mxu2 %v2944_v5  ;;  %1832 = vmatpush.bf16.msra.mxu3 %v3072_v9  ;;  %v1516_v7 = vadd.f32 %v1515_v57, %v1502_v4  ;;  %v3498_v9 = vld [vmem:[#allocation7 + $0x10] sm:$0xff]  ;;  %v3527_v4 = vld [vmem:[#allocation7 + $0xf8] sm:$0xff] }
  0xe6   :  { %1791 = vmatpush.bf16.msra.mxu0 %v2672_v16 }
  0xe7   :  { %1805 = vmatpush.bf16.msra.mxu1 %v2800_v17  ;;  %v1530_v13 = vadd.f32 %v1529_v55, %v1516_v7  ;;  %v3497_v17 = vld [vmem:[#allocation7 + $0x8] sm:$0xff] }
  0xe8   :  { %v3517_v55 = vld [vmem:[#allocation7 + $0xa8] sm:$0xff] }
  0xe9   :  { %1819 = vmatpush.bf16.msra.mxu2 %v2928_v18  ;;  %1833 = vmatpush.bf16.msra.mxu3 %v3056_v24  ;;  %v1557_v5 = vpop.f32.mrf.mxu3 }
  0xea   :  { %1792 = vmatpush.bf16.msra.mxu0 %v2656_v30 }
  0xeb   :  { %1806 = vmatpush.bf16.msra.mxu1 %v2784_v32 }
  0xed   :  { %1820 = vmatpush.bf16.msra.mxu2 %v2912_v33  ;;  %1834 = vmatpush.bf16.msra.mxu3 %v3040_v39 }
  0xee   :  { %1793 = vmatpush.bf16.msra.mxu0 %v2640_v48 }
  0xef   :  { %1807 = vmatpush.bf16.msra.mxu1 %v2768_v49  ;;  %v1585_v16 = vpop.f32.mrf.mxu1 }
  0xf1   :  { %1821 = vmatpush.bf16.msra.mxu2 %v2896_v50  ;;  %1835 = vmatpush.bf16.msra.mxu3 %v3024_v11  ;;  %v1559_v19 = vpop.f32.mrf.mxu3 }
  0xf2   :  { %2110 = vmatpush.bf16.msrb.mxu0 %v3503_v51  ;;  %1808 = vmatmul.bf16.vlgmr.msra.gmra.mxu1 %v3703_v37  ;;  %v3508_v37 = vld [vmem:[#allocation7 + $0x60] sm:$0xff]  ;;  %v3519_v51 = vld [vmem:[#allocation7 + $0xb8] sm:$0xff] }
  0xf3   :  { %1794 = vmatmul.bf16.vlgmr.msra.gmra.mxu0 %v3700_v23  ;;  %2124 = vmatpush.bf16.msrb.mxu1 %v3511_v0  ;;  %v1543_v23 = vpop.f32.mrf.mxu2 }
  0xf4   :  { %1822 = vmatmul.bf16.vlgmr.msra.gmra.mxu2 %v3707_v42  ;;  %1836 = vmatmul.bf16.vlgmr.msra.gmra.mxu3 %v3705_v41  ;;  %v1517_v42 = vpop.f32.mrf.mxu0  ;;  %v3507_v41 = vld [vmem:[#allocation7 + $0x58] sm:$0xff]  ;;  %v1544_v21 = vadd.f32 %v1543_v23, %v1530_v13 }
  0xf5   :  { %v1518_v8 = vadd.f32 %v1517_v42, %v1504_v2  ;;  %2138 = vmatpush.bf16.msrb.mxu2 %v3519_v51  ;;  %2152 = vmatpush.bf16.msrb.mxu3 %v3527_v4 }
  0xf6   :  { %2111 = vmatpush.bf16.msrb.mxu0 %v3502_v53  ;;  %v1842_v26 = vmax.f32 %v1544_v21, 0.0 }
  0xf7   :  { %2125 = vmatpush.bf16.msrb.mxu1 %v3510_v54  ;;  %v1532_v14 = vadd.f32 %v1531_v6, %v1518_v8  ;;  %v1587_v31 = vpop.f32.mrf.mxu1  ;;  %v3518_v54 = vld [vmem:[#allocation7 + $0xb0] sm:$0xff] }
  0xf9   :  { %v1613_v32 = vpop.f32.mrf.mxu3  ;;  %2139 = vmatpush.bf16.msrb.mxu2 %v3518_v54 }
  0xfa   :  { %2112 = vmatpush.bf16.msrb.mxu0 %v3501_v59 }
  0xfb   :  { %2126 = vmatpush.bf16.msrb.mxu1 %v3509_v61  ;;  %v1545_v12 = vpop.f32.mrf.mxu2 }
  0xfc   :  { %v1571_v15 = vpop.f32.mrf.mxu0  ;;  %v1546_v18 = vadd.f32 %v1545_v12, %v1532_v14  ;;  %v3525_v12 = vld [vmem:[#allocation7 + $0xe8] sm:$0xff] }
  0xfd   :  { %v1572_v28 = vadd.f32 %v1571_v15, %v1557_v5  ;;  %2140 = vmatpush.bf16.msrb.mxu2 %v3517_v55  ;;  %v3526_v5 = vld [vmem:[#allocation7 + $0xf0] sm:$0xff] }
  0xfe   :  { %2113 = vmatpush.bf16.msrb.mxu0 %v3500_v1  ;;  %v1846_v24 = vmax.f32 %v1546_v18, 0.0  ;;  %v3512_v1 = vld [vmem:[#allocation7 + $0x80] sm:$0xff]  ;;  %2153 = vmatpush.bf16.msrb.mxu3 %v3526_v5 }
  0xff   :  { %2127 = vmatpush.bf16.msrb.mxu1 %v3508_v37  ;;  %v1586_v33 = vadd.f32 %v1585_v16, %v1572_v28  ;;  %v3524_v16 = vld [vmem:[#allocation7 + $0xe0] sm:$0xff]  ;;  %v3522_v28 = vld [vmem:[#allocation7 + $0xd0] sm:$0xff] }
 0x100   :  { %v1850_v29 = vpack.c.bf16 %v1846_v24, %v1842_v26 }
 0x101   :  { %v1615_v45 = vpop.f32.mrf.mxu3  ;;  %2141 = vmatpush.bf16.msrb.mxu2 %v3516_v56 }
 0x102   :  { %2114 = vmatpush.bf16.msrb.mxu0 %v3499_v62  ;;  %2154 = vmatpush.bf16.msrb.mxu3 %v3525_v12 }
 0x103   :  { %2128 = vmatpush.bf16.msrb.mxu1 %v3507_v41  ;;  %v1599_v27 = vpop.f32.mrf.mxu2 }
 0x104   :  { %v1573_v30 = vpop.f32.mrf.mxu0  ;;  %v1600_v35 = vadd.f32 %v1599_v27, %v1586_v33 }
 0x105   :  { %v1574_v34 = vadd.f32 %v1573_v30, %v1559_v19  ;;  %2142 = vmatpush.bf16.msrb.mxu2 %v3515_v58 }
 0x106   :  { %2115 = vmatpush.bf16.msrb.mxu0 %v3498_v9  ;;  %v1614_v43 = vadd.f32 %v1613_v32, %v1600_v35  ;;  %2155 = vmatpush.bf16.msrb.mxu3 %v3524_v16  ;;  %v3521_v32 = vld [vmem:[#allocation7 + $0xc8] sm:$0xff] }
 0x107   :  { %2129 = vmatpush.bf16.msrb.mxu1 %v3506_v10  ;;  %v1588_v39 = vadd.f32 %v1587_v31, %v1574_v34  ;;  %v3520_v34 = vld [vmem:[#allocation7 + $0xc0] sm:$0xff] }
 0x109   :  { %2143 = vmatpush.bf16.msrb.mxu2 %v3514_v60 }
 0x10a   :  { %2116 = vmatpush.bf16.msrb.mxu0 %v3497_v17 }
 0x10b   :  { %2130 = vmatpush.bf16.msrb.mxu1 %v3505_v20  ;;  %v1601_v36 = vpop.f32.mrf.mxu2 }
 0x10c   :  { %v1602_v44 = vadd.f32 %v1601_v36, %v1588_v39 }
 0x10d   :  { %2144 = vmatpush.bf16.msrb.mxu2 %v3513_v63 }
 0x10e   :  { %2117 = vmatpush.bf16.msrb.mxu0 %v3496_v22  ;;  %v1616_v47 = vadd.f32 %v1615_v45, %v1602_v44  ;;  %v3523_v22 = vld [vmem:[#allocation7 + $0xd8] sm:$0xff] }
 0x10f   :  { %2131 = vmatpush.bf16.msrb.mxu1 %v3504_v25  ;;  %v1641_v40 = vpop.f32.mrf.mxu1  ;;  %2156 = vmatpush.bf16.msrb.mxu3 %v3523_v22 }
 0x110   :  { %v1627_v38 = vpop.f32.mrf.mxu0 }
 0x111   :  { %2118 = vmatmul.bf16.vlgmr.msrb.gmra.mxu0 %v1850_v29  ;;  %v1628_v46 = vadd.f32 %v1627_v38, %v1614_v43  ;;  %2145 = vmatpush.bf16.msrb.mxu2 %v3512_v1 }
 0x113   :  { %v1642_v49 = vadd.f32 %v1641_v40, %v1628_v46  ;;  %2157 = vmatpush.bf16.msrb.mxu3 %v3522_v28 }
 0x115   :  { %v1843_v52 = vmax.f32 %v1642_v49, 0.0 }
 0x117   :  { %v1643_v11 = vpop.f32.mrf.mxu1  ;;  %v1655_v59 = vpop.f32.mrf.mxu2  ;;  %2158 = vmatpush.bf16.msrb.mxu3 %v3521_v32 }
 0x118   :  { %v1629_v48 = vpop.f32.mrf.mxu0  ;;  %v1669_v61 = vpop.f32.mrf.mxu3 }
 0x119   :  { %v1630_v50 = vadd.f32 %v1629_v48, %v1616_v47  ;;  %v1670_v6 = vadd.f32 %v1669_v61, %v1655_v59 }
 0x11b   :  { %v1644_v0 = vadd.f32 %v1643_v11, %v1630_v50  ;;  %2159 = vmatpush.bf16.msrb.mxu3 %v3520_v34 }
 0x11d   :  { %v1847_v53 = vmax.f32 %v1644_v0, 0.0 }
 0x11f   :  { %v1851_v57 = vpack.c.bf16 %v1847_v53, %v1843_v52  ;;  %v1657_v23 = vpop.f32.mrf.mxu2 }
 0x120   :  { %v1671_v37 = vpop.f32.mrf.mxu3 }
 0x121   :  { %2132 = vmatmul.bf16.vlgmr.msrb.gmra.mxu1 %v1851_v57  ;;  %v1672_v8 = vadd.f32 %v1671_v37, %v1657_v23 }
 0x12f   :  { %v1697_v42 = vpop.f32.mrf.mxu1 }
 0x130   :  { %v1683_v3 = vpop.f32.mrf.mxu0 }
 0x131   :  { %v1684_v41 = vadd.f32 %v1683_v3, %v1670_v6  ;;  %v2166_v3 = vlaneseq }
 0x133   :  { %v1698_v9 = vadd.f32 %v1697_v42, %v1684_v41  ;;  %v2167_v42 = vand.u32 127, %v2166_v3 }
 0x135   :  { %vm2168_vm0 = vcmp.lt.s32.totalorder %v2167_v42, 10 }
 0x137   :  { %v1711_v62 = vpop.f32.mrf.mxu2  ;;  %v1725_v7 = vpop.f32.mrf.mxu3 }
 0x138   :  { %v1685_v2 = vpop.f32.mrf.mxu0  ;;  %v1699_v13 = vpop.f32.mrf.mxu1  ;;  %v1712_v17 = vadd.f32 %v1711_v62, %v1698_v9 }
 0x139   :  { %v1686_v10 = vadd.f32 %v1685_v2, %v1672_v8 }
 0x13a   :  { %v1726_v21 = vadd.f32 %v1725_v7, %v1712_v17 }
 0x13b   :  { %v1700_v18 = vadd.f32 %v1699_v13, %v1686_v10 }
 0x13f   :  { %v1713_v14 = vpop.f32.mrf.mxu2  ;;  %v1727_v20 = vpop.f32.mrf.mxu3 }
 0x140   :  { %v1714_v19 = vadd.f32 %v1713_v14, %v1700_v18 }
 0x142   :  { %v1728_v24 = vadd.f32 %v1727_v20, %v1714_v19 }
 0x14f   :  { %v1753_v33 = vpop.f32.mrf.mxu1 }
 0x150   :  { %v1739_v15 = vpop.f32.mrf.mxu0 }
 0x151   :  { %v1740_v25 = vadd.f32 %v1739_v15, %v1726_v21 }
 0x153   :  { %v1844_v29 = vmax.f32 %v1740_v25, 0.0 }
 0x157   :  { %v1767_v35 = vpop.f32.mrf.mxu2  ;;  %v1781_v36 = vpop.f32.mrf.mxu3 }
 0x158   :  { %v1741_v26 = vpop.f32.mrf.mxu0  ;;  %v1755_v38 = vpop.f32.mrf.mxu1  ;;  %v1768_v40 = vadd.f32 %v1767_v35, %v1753_v33 }
 0x159   :  { %v1742_v27 = vadd.f32 %v1741_v26, %v1728_v24 }
 0x15a   :  { %v1782_v46 = vadd.f32 %v1781_v36, %v1768_v40 }
 0x15b   :  { %v1848_v30 = vmax.f32 %v1742_v27, 0.0 }
 0x15d   :  { %v1852_v31 = vpack.c.bf16 %v1848_v30, %v1844_v29 }
 0x15f   :  { %2146 = vmatmul.bf16.vlgmr.msrb.gmra.mxu2 %v1852_v31  ;;  %v1769_v39 = vpop.f32.mrf.mxu2  ;;  %v1783_v43 = vpop.f32.mrf.mxu3 }
 0x160   :  { %v1770_v47 = vadd.f32 %v1769_v39, %v1755_v38 }
 0x162   :  { %v1784_v50 = vadd.f32 %v1783_v43, %v1770_v47 }
 0x16f   :  { %v1809_v45 = vpop.f32.mrf.mxu1 }
 0x170   :  { %v1795_v44 = vpop.f32.mrf.mxu0 }
 0x171   :  { %v1796_v48 = vadd.f32 %v1795_v44, %v1782_v46 }
 0x173   :  { %v1810_v0 = vadd.f32 %v1809_v45, %v1796_v48 }
 0x177   :  { %v1823_v49 = vpop.f32.mrf.mxu2  ;;  %v1837_v11 = vpop.f32.mrf.mxu3 }
 0x178   :  { %v1797_v51 = vpop.f32.mrf.mxu0  ;;  %v1824_v53 = vadd.f32 %v1823_v49, %v1810_v0  ;;  %v1811_v57 = vpop.f32.mrf.mxu1 }
 0x179   :  { %v1798_v52 = vadd.f32 %v1797_v51, %v1784_v50 }
 0x17a   :  { %v1838_v56 = vadd.f32 %v1837_v11, %v1824_v53 }
 0x17b   :  { %v1812_v54 = vadd.f32 %v1811_v57, %v1798_v52 }
 0x17c   :  { %v1845_v61 = vmax.f32 %v1838_v56, 0.0 }
 0x17f   :  { %v1825_v55 = vpop.f32.mrf.mxu2  ;;  %v1839_v59 = vpop.f32.mrf.mxu3 }
 0x180   :  { %v1826_v58 = vadd.f32 %v1825_v55, %v1812_v54 }
 0x182   :  { %v1840_v60 = vadd.f32 %v1839_v59, %v1826_v58 }
 0x184   :  { %v1849_v63 = vmax.f32 %v1840_v60, 0.0 }
 0x186   :  { %v1853_v23 = vpack.c.bf16 %v1849_v63, %v1845_v61 }
 0x188   :  { %2160 = vmatmul.bf16.vlgmr.msrb.gmra.mxu3 %v1853_v23 }
 0x18e   :  { %v2119_v37 = vpop.f32.mrf.mxu0 }
 0x196   :  { %v2121_v8 = vpop.f32.mrf.mxu0 }
 0x19e   :  { %v2133_v1 = vpop.f32.mrf.mxu1 }
 0x19f   :  { %v2134_v5 = vadd.f32 %v2133_v1, %v2119_v37 }
 0x1a6   :  { %v2135_v41 = vpop.f32.mrf.mxu1 }
 0x1a7   :  { %v2136_v10 = vadd.f32 %v2135_v41, %v2121_v8 }
 0x1e2   :  { %v2147_v4 = vpop.f32.mrf.mxu2 }
 0x1e3   :  { %v2148_v6 = vadd.f32 %v2147_v4, %v2134_v5 }
 0x1ea   :  { %v2149_v9 = vpop.f32.mrf.mxu2 }
 0x1eb   :  { %v2150_v12 = vadd.f32 %v2149_v9, %v2136_v10 }
 0x20b   :  { %v2161_v62 = vpop.f32.mrf.mxu3 }
 0x20c   :  { %v2162_v2 = vadd.f32 %v2161_v62, %v2148_v6 }
 0x20e   :  { %v2169_v7 = vsel %vm2168_vm0, %v2162_v2, -1e+30 }
 0x20f   :  { %2171 = vmax.xlane.f32.xlu0 %v2169_v7 }
 0x213   :  { %v2163_v13 = vpop.f32.mrf.mxu3 }
 0x214   :  { %v2164_v14 = vadd.f32 %v2163_v13, %v2150_v12 }
 0x216   :  { %v2170_v15 = vsel %vm2168_vm0, %v2164_v14, -1e+30 }
 0x217   :  { %2173 = vmax.xlane.f32.xlu0 %v2170_v15 }
 0x282   :  { %v2172_v16 = vpop.xlane.xlu0 %2171 }
 0x283   :  { %v2175_v17 = vsub.f32 %v2169_v7, %v2172_v16 }
 0x285   :  { %v2177_v18 = vmul.f32 1.442695, %v2175_v17 }
 0x287   :  { %3540 = vpow2.f32 %v2177_v18 }
 0x28a   :  { %v2174_v19 = vpop.xlane.xlu0 %2173 }
 0x28b   :  { %v2176_v20 = vsub.f32 %v2170_v15, %v2174_v19 }
 0x28d   :  { %v3541_v21 = vpop.eup %3540  ;;  %v2179_v22 = vmul.f32 1.442695, %v2176_v20 }
 0x28e   :  { %2181 = vadd.xlane.f32.xlu1 %v3541_v21 }
 0x28f   :  { %3542 = vpow2.f32 %v2179_v22 }
 0x295   :  { %v3543_v24 = vpop.eup %3542 }
 0x296   :  { %2183 = vadd.xlane.f32.xlu1 %v3543_v24 }
 0x301   :  { %v2182_v25 = vpop.xlane.xlu1 %2181 }
 0x302   :  { %3544 = vlog2.f32 %v2182_v25 }
 0x308   :  { %v3545_v26 = vpop.eup %3544 }
 0x309   :  { %v2186_v27 = vmul.f32 0.6931472, %v3545_v26  ;;  %v2184_v28 = vpop.xlane.xlu1 %2183 }
 0x30a   :  { %3546 = vlog2.f32 %v2184_v28 }
 0x30b   :  { %v2189_v29 = vsub.f32 %v2175_v17, %v2186_v27 }
 0x30d   :  { %2191 = vst [vmem:[#allocation8] sm:$0xff] %v2189_v29 }
 0x310   :  { %v3547_v30 = vpop.eup %3546 }
 0x311   :  { %v2188_v31 = vmul.f32 0.6931472, %v3547_v30 }
 0x313   :  { %v2190_v32 = vsub.f32 %v2176_v20, %v2188_v31 }
 0x315   :  { %2192 = vst [vmem:[#allocation8 + $0x8] sm:$0xff] %v2190_v32 }
 0x316   :  { %2205 = dma.vmem_to_hbm [thread:$0]  %s2198_s4, 256, %s2200_s7, [#allocation4], %s3660_s8, %s3660_s8, %s3661_s9  }
 0x317   :  { %3648 = dma.done.wait [#allocation4], 256  }
 0x318   :  { %3649 = vsyncadd [#allocation4], 4294967040 }
 0x319   :  { %2210 = vsyncpa [#allocation3], 1 }
 0x31a   :  { %2211 = vsyncpa [#allocation6], 1 }
 0x31b   :  { %2212 = vsyncpa [#allocation4], 1 }

</bundles_post_ra>
